<compile_context>
chip_gen: v7x
topology: tpu7x:2x2x1
jax: 0.10.0
libtpu: 0.0.40
codegen_flags: <defaults>
</compile_context>

<pallas_src>
import math

import jax
import jax.numpy as jnp
from jax.experimental import pallas as pl
from jax.experimental.pallas import tpu as pltpu

# ------------------------------- config -------------------------------------
VOCAB = 64        # config.embedding.vocab_size
N_EMBD = 32       # config.embedding.n_embd
SEQ = 8           # config.embedding.sequence_length
N_HEAD = 4        # config.transformer.n_head
N_LAYER = 2       # config.transformer.n_layer_decoder
BATCH = 2
HEAD_DIM = N_EMBD // N_HEAD
EPS = 1e-5        # nn.LayerNorm default eps

BT = BATCH * SEQ                 # folded batch*seq rows
BHT = BATCH * N_HEAD * SEQ       # rows of the block-diagonal attention
LOG2_SEQ = SEQ.bit_length() - 1  # SEQ is a power of two

# -------------------- packed weight-slab layouts (static) --------------------
# slab32: width 32 (f32)
OFF_TOK = 0                       # tok_emb            (VOCAB, 32)   rows  0..63
OFF_POS = 64                      # pos_emb tiled to   (BT, 32)      rows 64..79
L32_BASE = 80                     # per-layer section starts here (8-aligned)
R_LN1W, R_LN1B, R_LN2W, R_LN2B, R_BO, R_B2 = 0, 1, 2, 3, 4, 5   # 1 row each
R_WO = 8                          # Wo  (32, 32)
R_W2 = 40                         # W2  (128, 32)
L32_STRIDE = 168
OFF_LNFW = L32_BASE + N_LAYER * L32_STRIDE        # 416
OFF_LNFB = OFF_LNFW + 1                           # 417
S32_ROWS = 424

# slab128: width 128 (f32)
R_WQKV = 0                        # Wqkv (32, 96)  (Q cols pre-scaled)
R_W1 = 32                         # W1   (32, 128)
R_BQKV = 64                       # bqkv (1, 96)
R_B1 = 65                         # b1   (1, 128)
L128_STRIDE = 72
OFF_HEAD = N_LAYER * L128_STRIDE                  # 144, head_w (32, 64)
S128_ROWS = 176


# --------------------------- in-kernel helpers -------------------------------
def _layernorm(x, w, b):
    # x: (R, E), w/b: (1, E)
    mu = jnp.mean(x, axis=-1, keepdims=True)
    var = jnp.mean((x - mu) ** 2, axis=-1, keepdims=True)
    return (x - mu) * jax.lax.rsqrt(var + EPS) * w + b


# --------------------------- fused forward kernel ----------------------------
def babyjoey_kernel(tok_ref, s32_ref, s128_ref, out_ref):
    """Whole BabyJoey forward in one invocation.

    tok_ref:  (B*T, 1) int32
    s32_ref:  (S32_ROWS, 32) f32   packed narrow weights (see layout above)
    s128_ref: (S128_ROWS, 128) f32 packed wide weights
    out_ref:  (B*T, 128) f32       logits, lane-dense (cols >= VOCAB are 0)
    """
    E, H, Dh = N_EMBD, N_HEAD, HEAD_DIM

    # --- embeddings: token one-hot matmul (MXU) + (pre-tiled) positional add ---
    tok = tok_ref[...]                                                  # (BT, 1)
    onehot = (jax.lax.broadcasted_iota(jnp.int32, (BT, VOCAB), 1) == tok
              ).astype(jnp.float32)                                     # (BT, V)
    tok_emb = s32_ref[OFF_TOK:OFF_TOK + VOCAB, :]                       # (V, E)
    pos_emb = s32_ref[OFF_POS:OFF_POS + BT, :]                          # (BT, E)
    x = jnp.dot(onehot, tok_emb, preferred_element_type=jnp.float32) + pos_emb

    # --- block-diagonal softmax mask, built ONCE (blocks = (head, batch)) ---
    rblk = jax.lax.broadcasted_iota(jnp.int32, (BHT, BHT), 0) >> LOG2_SEQ
    cblk = jax.lax.broadcasted_iota(jnp.int32, (BHT, BHT), 1) >> LOG2_SEQ
    attn_mask = jnp.where(rblk == cblk, 0.0, -1e30).astype(jnp.float32)  # (BHT,BHT)

    # --- decoder blocks (static unroll; weights resident in VMEM) ---
    for l in range(N_LAYER):
        b32 = L32_BASE + l * L32_STRIDE
        b128 = l * L128_STRIDE
        ln1_w = s32_ref[b32 + R_LN1W:b32 + R_LN1W + 1, :]
        ln1_b = s32_ref[b32 + R_LN1B:b32 + R_LN1B + 1, :]
        ln2_w = s32_ref[b32 + R_LN2W:b32 + R_LN2W + 1, :]
        ln2_b = s32_ref[b32 + R_LN2B:b32 + R_LN2B + 1, :]
        bo = s32_ref[b32 + R_BO:b32 + R_BO + 1, :]
        b2 = s32_ref[b32 + R_B2:b32 + R_B2 + 1, :]
        wo = s32_ref[b32 + R_WO:b32 + R_WO + E, :]                       # (E, E)
        w2 = s32_ref[b32 + R_W2:b32 + R_W2 + 4 * E, :]                   # (4E, E)
        wqkv = s128_ref[b128 + R_WQKV:b128 + R_WQKV + E, :3 * E]         # (E, 3E)
        bqkv = s128_ref[b128 + R_BQKV:b128 + R_BQKV + 1, :3 * E]         # (1, 3E)
        w1 = s128_ref[b128 + R_W1:b128 + R_W1 + E, :]                    # (E, 4E)
        b1 = s128_ref[b128 + R_B1:b128 + R_B1 + 1, :]                    # (1, 4E)

        # --- attention (block-diagonal over (head, batch)) ---
        xn = _layernorm(x, ln1_w, ln1_b)                                 # (BT, E)
        qkv = jnp.dot(xn, wqkv, preferred_element_type=jnp.float32) + bqkv  # (BT,3E)
        # regroup to (H*B*T, Dh), row order (h, b, t) — static slices + concat
        qh = jnp.concatenate(
            [qkv[:, h * Dh:(h + 1) * Dh] for h in range(H)], axis=0)
        kh = jnp.concatenate(
            [qkv[:, E + h * Dh:E + (h + 1) * Dh] for h in range(H)], axis=0)
        vh = jnp.concatenate(
            [qkv[:, 2 * E + h * Dh:2 * E + (h + 1) * Dh] for h in range(H)], axis=0)
        s = jax.lax.dot_general(qh, kh, (((1,), (1,)), ((), ())),
                                preferred_element_type=jnp.float32) + attn_mask
        s = s - jnp.max(s, axis=-1, keepdims=True)
        p = jnp.exp(s)
        p = p * pl.reciprocal(jnp.sum(p, axis=-1, keepdims=True), approx=True)
        oh = jnp.dot(p, vh, preferred_element_type=jnp.float32)          # (BHT, Dh)
        # back to (BT, E) with head-major columns
        o = jnp.concatenate([oh[h * BT:(h + 1) * BT, :] for h in range(H)], axis=1)
        attn = jnp.dot(o, wo, preferred_element_type=jnp.float32) + bo
        x = x + attn                                                     # residual 1

        # --- MLP ---
        xn = _layernorm(x, ln2_w, ln2_b)
        h1 = jnp.maximum(
            jnp.dot(xn, w1, preferred_element_type=jnp.float32) + b1, 0.0)
        x = x + jnp.dot(h1, w2, preferred_element_type=jnp.float32) + b2  # residual 2

    # --- final LN + vocab head (lane-dense 128-wide store) ---
    xn = _layernorm(x, s32_ref[OFF_LNFW:OFF_LNFW + 1, :],
                    s32_ref[OFF_LNFB:OFF_LNFB + 1, :])
    head_w = s128_ref[OFF_HEAD:OFF_HEAD + N_EMBD, :]                     # (E, 128)
    out_ref[...] = jnp.dot(xn, head_w, preferred_element_type=jnp.float32)


# ------------------------------ weight packing -------------------------------
def prepare_kernel_params(params, B, T):
    """Pack canonical (PyTorch-style) params into two contiguous f32 slabs."""
    E = N_EMBD
    scale = 1.0 / math.sqrt(HEAD_DIM)
    # fold 1/sqrt(Dh) into the Q third of the fused QKV projection
    qmult = jnp.concatenate([jnp.full((E,), scale, jnp.float32),
                             jnp.ones((2 * E,), jnp.float32)])

    def place(slab, row, a, mult=None):
        a = jnp.asarray(a, jnp.float32)
        if mult is not None:
            a = a * mult
        if a.ndim == 1:
            a = a.reshape(1, -1)
        return slab.at[row:row + a.shape[0], :a.shape[1]].set(a)

    s32 = jnp.zeros((S32_ROWS, 32), jnp.float32)
    s128 = jnp.zeros((S128_ROWS, 128), jnp.float32)

    s32 = place(s32, OFF_TOK, params["tok_emb"])
    s32 = place(s32, OFF_POS, jnp.tile(params["pos_emb"][:T], (B, 1)))
    for l, bp in enumerate(params["blocks"]):
        b32 = L32_BASE + l * L32_STRIDE
        b128 = l * L128_STRIDE
        s32 = place(s32, b32 + R_LN1W, bp["ln1_w"])
        s32 = place(s32, b32 + R_LN1B, bp["ln1_b"])
        s32 = place(s32, b32 + R_LN2W, bp["ln2_w"])
        s32 = place(s32, b32 + R_LN2B, bp["ln2_b"])
        s32 = place(s32, b32 + R_BO, bp["bo"])
        s32 = place(s32, b32 + R_B2, bp["b2"])
        s32 = place(s32, b32 + R_WO, bp["wo"])
        s32 = place(s32, b32 + R_W2, bp["w2"])
        s128 = place(s128, b128 + R_WQKV, bp["wqkv"], mult=qmult)
        s128 = place(s128, b128 + R_BQKV, bp["bqkv"], mult=qmult)
        s128 = place(s128, b128 + R_W1, bp["w1"])
        s128 = place(s128, b128 + R_B1, bp["b1"])
    s32 = place(s32, OFF_LNFW, params["lnf_w"])
    s32 = place(s32, OFF_LNFB, params["lnf_b"])
    s128 = place(s128, OFF_HEAD, params["head_w"])
    return s32, s128


# -------------------------------- wrapper ------------------------------------
def babyjoey_forward_pallas(tokens, params):
    B, T = tokens.shape
    assert B == BATCH and T == SEQ
    slab32, slab128 = prepare_kernel_params(params, B, T)
    tok = tokens.reshape(B * T, 1).astype(jnp.int32)

    out = pl.pallas_call(
        babyjoey_kernel,
        out_shape=jax.ShapeDtypeStruct((B * T, 128), jnp.float32),
        grid=(1,),   # single step: whole forward fused, batch folded into rows
        in_specs=[
            pl.BlockSpec((B * T, 1), lambda i: (0, 0)),
            pl.BlockSpec((S32_ROWS, 32), lambda i: (0, 0)),
            pl.BlockSpec((S128_ROWS, 128), lambda i: (0, 0)),
        ],
        out_specs=pl.BlockSpec((B * T, 128), lambda i: (0, 0)),
        compiler_params=pltpu.CompilerParams(dimension_semantics=("arbitrary",)),
    )(tok, slab32, slab128)
    return out[:, :VOCAB].reshape(B, T, VOCAB)


# --------------------------- pure-JAX reference -------------------------------
def _ref_ln(x, w, b):
    mu = jnp.mean(x, axis=-1, keepdims=True)
    var = jnp.mean((x - mu) ** 2, axis=-1, keepdims=True)
    return (x - mu) * jax.lax.rsqrt(var + EPS) * w + b


def _ref_block(x, p):
    HI = jax.lax.Precision.HIGHEST
    B, T, E = x.shape
    xn = _ref_ln(x, p["ln1_w"][0], p["ln1_b"][0])
    qkv = jnp.einsum("bte,ef->btf", xn, p["wqkv"], precision=HI) + p["bqkv"][0]
    q, k, v = jnp.split(qkv, 3, axis=-1)
    q = q.reshape(B, T, N_HEAD, HEAD_DIM)
    k = k.reshape(B, T, N_HEAD, HEAD_DIM)
    v = v.reshape(B, T, N_HEAD, HEAD_DIM)
    scores = jnp.einsum("bthd,bshd->bhts", q, k, precision=HI) / math.sqrt(HEAD_DIM)
    p_attn = jax.nn.softmax(scores, axis=-1)
    out = jnp.einsum("bhts,bshd->bthd", p_attn, v, precision=HI).reshape(B, T, E)
    attn = jnp.einsum("bte,ef->btf", out, p["wo"], precision=HI) + p["bo"][0]
    x = x + attn
    xn = _ref_ln(x, p["ln2_w"][0], p["ln2_b"][0])
    h1 = jax.nn.relu(jnp.einsum("bte,ef->btf", xn, p["w1"], precision=HI) + p["b1"][0])
    mlp = jnp.einsum("btf,fe->bte", h1, p["w2"], precision=HI) + p["b2"][0]
    return x + mlp


def babyjoey_forward_ref(tokens, params):
    HI = jax.lax.Precision.HIGHEST
    x = params["tok_emb"][tokens] + params["pos_emb"][:tokens.shape[1]][None, :, :]
    for bp in params["blocks"]:
        x = _ref_block(x, bp)
    x = _ref_ln(x, params["lnf_w"][0], params["lnf_b"][0])
    return jnp.einsum("bte,ev->btv", x, params["head_w"], precision=HI)


# ----------------------------- init & main ------------------------------------
def init_params(key):
    keys = iter(jax.random.split(key, 256))

    def nrm(shape, s):
        return jax.random.normal(next(keys), shape, jnp.float32) * s

    params = {
        "tok_emb": nrm((VOCAB, N_EMBD), 1.0),       # nn.Embedding ~ N(0,1)
        "pos_emb": nrm((SEQ, N_EMBD), 1.0),
        "lnf_w": jnp.ones((1, N_EMBD), jnp.float32),
        "lnf_b": jnp.zeros((1, N_EMBD), jnp.float32),
        "head_w": nrm((N_EMBD, VOCAB), 0.02),       # (in, out), no bias
        "blocks": [],
    }
    for _ in range(N_LAYER):
        params["blocks"].append({
            "ln1_w": jnp.ones((1, N_EMBD), jnp.float32),
            "ln1_b": jnp.zeros((1, N_EMBD), jnp.float32),
            "wqkv": nrm((N_EMBD, 3 * N_EMBD), 0.02),
            "bqkv": nrm((1, 3 * N_EMBD), 0.01),
            "wo": nrm((N_EMBD, N_EMBD), 0.02),
            "bo": nrm((1, N_EMBD), 0.01),
            "ln2_w": jnp.ones((1, N_EMBD), jnp.float32),
            "ln2_b": jnp.zeros((1, N_EMBD), jnp.float32),
            "w1": nrm((N_EMBD, 4 * N_EMBD), 0.02),
            "b1": nrm((1, 4 * N_EMBD), 0.01),
            "w2": nrm((4 * N_EMBD, N_EMBD), 0.02),
            "b2": nrm((1, N_EMBD), 0.01),
        })
    return params


if __name__ == "__main__":
    root = jax.random.PRNGKey(0)
    pkey, tkey = jax.random.split(root)
    params = init_params(pkey)
    tokens = jax.random.randint(tkey, (BATCH, SEQ), 0, VOCAB, dtype=jnp.int32)

    logits = jax.block_until_ready(babyjoey_forward_pallas(tokens, params))
    assert logits.shape == (BATCH, SEQ, VOCAB), logits.shape

    ref = jax.block_until_ready(babyjoey_forward_ref(tokens, params))
    assert jnp.allclose(logits, ref, atol=2e-3, rtol=2e-2), (
        float(jnp.max(jnp.abs(logits - ref))))

    print("KERNEL_OK")
</pallas_src>

<mosaic_0001>
module attributes {stable_mosaic.version = 11 : i64} {
  func.func @babyjoey_kernel(%arg0: i32, %arg1: memref<16x1xi32, #tpu.memory_space<vmem>>, %arg2: memref<424x32xf32, #tpu.memory_space<vmem>>, %arg3: memref<176x128xf32, #tpu.memory_space<vmem>>, %arg4: memref<16x128xf32, #tpu.memory_space<vmem>>) attributes {dimension_semantics = [#tpu.dimension_semantics<arbitrary>], iteration_bounds = array<i64: 1>, scalar_prefetch = 0 : i64, scratch_operands = 0 : i64, tpu.core_type = #tpu.core_type<tc>, window_params = [{pipeline_mode = #tpu.pipeline_mode<synchronous>, transform_indices = @transform_0, window_bounds = array<i64: 16, 1>}, {pipeline_mode = #tpu.pipeline_mode<synchronous>, transform_indices = @transform_1, window_bounds = array<i64: 424, 32>}, {pipeline_mode = #tpu.pipeline_mode<synchronous>, transform_indices = @transform_2, window_bounds = array<i64: 176, 128>}, {pipeline_mode = #tpu.pipeline_mode<synchronous>, transform_indices = @transform_3, window_bounds = array<i64: 16, 128>}]} {
    %c0 = arith.constant 0 : index
    %c0_0 = arith.constant 0 : index
    %0 = vector.load %arg1[%c0, %c0_0] : memref<16x1xi32, #tpu.memory_space<vmem>>, vector<16x1xi32>
    %1 = tpu.iota {dimensions = array<i32: 1>} : vector<16x64xi32>
    %2 = vector.broadcast %0 : vector<16x1xi32> to vector<16x64xi32>
    %3 = arith.cmpi eq, %1, %2 : vector<16x64xi32>
    %4 = arith.extui %3 : vector<16x64xi1> to vector<16x64xi32>
    %5 = arith.sitofp %4 : vector<16x64xi32> to vector<16x64xf32>
    %c0_1 = arith.constant 0 : index
    %c0_2 = arith.constant 0 : index
    %6 = vector.load %arg2[%c0_1, %c0_2] : memref<424x32xf32, #tpu.memory_space<vmem>>, vector<64x32xf32>
    %c64 = arith.constant 64 : index
    %c0_3 = arith.constant 0 : index
    %7 = vector.load %arg2[%c64, %c0_3] : memref<424x32xf32, #tpu.memory_space<vmem>>, vector<16x32xf32>
    %cst = arith.constant dense<0.000000e+00> : vector<16x32xf32>
    %8 = tpu.matmul %5, %6, %cst {dimension_numbers = #tpu.dot_dimension_numbers<[1], [0], [0], [1], [0, 0, 1, 1], [], []>} : vector<16x64xf32>, vector<64x32xf32>, vector<16x32xf32> -> vector<16x32xf32>
    %9 = arith.addf %8, %7 : vector<16x32xf32>
    %10 = tpu.iota {dimensions = array<i32: 0>} : vector<64x64xi32>
    %c3_i32 = arith.constant 3 : i32
    %11 = vector.broadcast %c3_i32 : i32 to vector<64x64xi32>
    %12 = arith.shrsi %10, %11 : vector<64x64xi32>
    %13 = tpu.iota {dimensions = array<i32: 1>} : vector<64x64xi32>
    %c3_i32_4 = arith.constant 3 : i32
    %14 = vector.broadcast %c3_i32_4 : i32 to vector<64x64xi32>
    %15 = arith.shrsi %13, %14 : vector<64x64xi32>
    %16 = arith.cmpi eq, %12, %15 : vector<64x64xi32>
    %cst_5 = arith.constant 0.000000e+00 : f32
    %cst_6 = arith.constant -1.000000e+30 : f32
    %17 = vector.broadcast %cst_5 : f32 to vector<64x64xf32>
    %18 = vector.broadcast %cst_6 : f32 to vector<64x64xf32>
    %19 = arith.select %16, %17, %18 : vector<64x64xi1>, vector<64x64xf32>
    %c80 = arith.constant 80 : index
    %c0_7 = arith.constant 0 : index
    %20 = vector.load %arg2[%c80, %c0_7] : memref<424x32xf32, #tpu.memory_space<vmem>>, vector<1x32xf32>
    %c81 = arith.constant 81 : index
    %c0_8 = arith.constant 0 : index
    %21 = vector.load %arg2[%c81, %c0_8] : memref<424x32xf32, #tpu.memory_space<vmem>>, vector<1x32xf32>
    %c82 = arith.constant 82 : index
    %c0_9 = arith.constant 0 : index
    %22 = vector.load %arg2[%c82, %c0_9] : memref<424x32xf32, #tpu.memory_space<vmem>>, vector<1x32xf32>
    %c83 = arith.constant 83 : index
    %c0_10 = arith.constant 0 : index
    %23 = vector.load %arg2[%c83, %c0_10] : memref<424x32xf32, #tpu.memory_space<vmem>>, vector<1x32xf32>
    %c84 = arith.constant 84 : index
    %c0_11 = arith.constant 0 : index
    %24 = vector.load %arg2[%c84, %c0_11] : memref<424x32xf32, #tpu.memory_space<vmem>>, vector<1x32xf32>
    %c85 = arith.constant 85 : index
    %c0_12 = arith.constant 0 : index
    %25 = vector.load %arg2[%c85, %c0_12] : memref<424x32xf32, #tpu.memory_space<vmem>>, vector<1x32xf32>
    %c88 = arith.constant 88 : index
    %c0_13 = arith.constant 0 : index
    %26 = vector.load %arg2[%c88, %c0_13] : memref<424x32xf32, #tpu.memory_space<vmem>>, vector<32x32xf32>
    %c120 = arith.constant 120 : index
    %c0_14 = arith.constant 0 : index
    %27 = vector.load %arg2[%c120, %c0_14] : memref<424x32xf32, #tpu.memory_space<vmem>>, vector<128x32xf32>
    %c0_15 = arith.constant 0 : index
    %c0_16 = arith.constant 0 : index
    %28 = vector.load %arg3[%c0_15, %c0_16] : memref<176x128xf32, #tpu.memory_space<vmem>>, vector<32x96xf32>
    %c64_17 = arith.constant 64 : index
    %c0_18 = arith.constant 0 : index
    %29 = vector.load %arg3[%c64_17, %c0_18] : memref<176x128xf32, #tpu.memory_space<vmem>>, vector<1x96xf32>
    %c32 = arith.constant 32 : index
    %c0_19 = arith.constant 0 : index
    %30 = vector.load %arg3[%c32, %c0_19] : memref<176x128xf32, #tpu.memory_space<vmem>>, vector<32x128xf32>
    %c65 = arith.constant 65 : index
    %c0_20 = arith.constant 0 : index
    %31 = vector.load %arg3[%c65, %c0_20] : memref<176x128xf32, #tpu.memory_space<vmem>>, vector<1x128xf32>
    %cst_21 = arith.constant dense<0.000000e+00> : vector<16xf32>
    %32 = vector.multi_reduction <add>, %9, %cst_21 [1] : vector<16x32xf32> to vector<16xf32>
    %33 = vector.shape_cast %32 : vector<16xf32> to vector<16x1xf32>
    %cst_22 = arith.constant 3.200000e+01 : f32
    %34 = vector.broadcast %cst_22 : f32 to vector<16x1xf32>
    %35 = arith.divf %33, %34 : vector<16x1xf32>
    %36 = vector.broadcast %35 : vector<16x1xf32> to vector<16x32xf32>
    %37 = arith.subf %9, %36 : vector<16x32xf32>
    %38 = arith.mulf %37, %37 : vector<16x32xf32>
    %cst_23 = arith.constant dense<0.000000e+00> : vector<16xf32>
    %39 = vector.multi_reduction <add>, %38, %cst_23 [1] : vector<16x32xf32> to vector<16xf32>
    %40 = vector.shape_cast %39 : vector<16xf32> to vector<16x1xf32>
    %cst_24 = arith.constant 3.200000e+01 : f32
    %41 = vector.broadcast %cst_24 : f32 to vector<16x1xf32>
    %42 = arith.divf %40, %41 : vector<16x1xf32>
    %43 = vector.broadcast %35 : vector<16x1xf32> to vector<16x32xf32>
    %44 = arith.subf %9, %43 : vector<16x32xf32>
    %cst_25 = arith.constant 9.99999974E-6 : f32
    %45 = vector.broadcast %cst_25 : f32 to vector<16x1xf32>
    %46 = arith.addf %42, %45 : vector<16x1xf32>
    %47 = math.rsqrt %46 : vector<16x1xf32>
    %48 = vector.broadcast %47 : vector<16x1xf32> to vector<16x32xf32>
    %49 = arith.mulf %44, %48 : vector<16x32xf32>
    %50 = vector.broadcast %20 : vector<1x32xf32> to vector<16x32xf32>
    %51 = arith.mulf %49, %50 : vector<16x32xf32>
    %52 = vector.broadcast %21 : vector<1x32xf32> to vector<16x32xf32>
    %53 = arith.addf %51, %52 : vector<16x32xf32>
    %cst_26 = arith.constant dense<0.000000e+00> : vector<16x96xf32>
    %54 = tpu.matmul %53, %28, %cst_26 {dimension_numbers = #tpu.dot_dimension_numbers<[1], [0], [0], [1], [0, 0, 1, 1], [], []>} : vector<16x32xf32>, vector<32x96xf32>, vector<16x96xf32> -> vector<16x96xf32>
    %55 = vector.broadcast %29 : vector<1x96xf32> to vector<16x96xf32>
    %56 = arith.addf %54, %55 : vector<16x96xf32>
    %57 = vector.extract_strided_slice %56 {offsets = [0, 0], sizes = [16, 8], strides = [1, 1]} : vector<16x96xf32> to vector<16x8xf32>
    %58 = vector.extract_strided_slice %56 {offsets = [0, 8], sizes = [16, 8], strides = [1, 1]} : vector<16x96xf32> to vector<16x8xf32>
    %59 = vector.extract_strided_slice %56 {offsets = [0, 16], sizes = [16, 8], strides = [1, 1]} : vector<16x96xf32> to vector<16x8xf32>
    %60 = vector.extract_strided_slice %56 {offsets = [0, 24], sizes = [16, 8], strides = [1, 1]} : vector<16x96xf32> to vector<16x8xf32>
    %61 = tpu.concatenate %57, %58, %59, %60 in 0 : vector<16x8xf32>, vector<16x8xf32>, vector<16x8xf32>, vector<16x8xf32> -> vector<64x8xf32>
    %62 = vector.extract_strided_slice %56 {offsets = [0, 32], sizes = [16, 8], strides = [1, 1]} : vector<16x96xf32> to vector<16x8xf32>
    %63 = vector.extract_strided_slice %56 {offsets = [0, 40], sizes = [16, 8], strides = [1, 1]} : vector<16x96xf32> to vector<16x8xf32>
    %64 = vector.extract_strided_slice %56 {offsets = [0, 48], sizes = [16, 8], strides = [1, 1]} : vector<16x96xf32> to vector<16x8xf32>
    %65 = vector.extract_strided_slice %56 {offsets = [0, 56], sizes = [16, 8], strides = [1, 1]} : vector<16x96xf32> to vector<16x8xf32>
    %66 = tpu.concatenate %62, %63, %64, %65 in 0 : vector<16x8xf32>, vector<16x8xf32>, vector<16x8xf32>, vector<16x8xf32> -> vector<64x8xf32>
    %67 = vector.extract_strided_slice %56 {offsets = [0, 64], sizes = [16, 8], strides = [1, 1]} : vector<16x96xf32> to vector<16x8xf32>
    %68 = vector.extract_strided_slice %56 {offsets = [0, 72], sizes = [16, 8], strides = [1, 1]} : vector<16x96xf32> to vector<16x8xf32>
    %69 = vector.extract_strided_slice %56 {offsets = [0, 80], sizes = [16, 8], strides = [1, 1]} : vector<16x96xf32> to vector<16x8xf32>
    %70 = vector.extract_strided_slice %56 {offsets = [0, 88], sizes = [16, 8], strides = [1, 1]} : vector<16x96xf32> to vector<16x8xf32>
    %71 = tpu.concatenate %67, %68, %69, %70 in 0 : vector<16x8xf32>, vector<16x8xf32>, vector<16x8xf32>, vector<16x8xf32> -> vector<64x8xf32>
    %cst_27 = arith.constant dense<0.000000e+00> : vector<64x64xf32>
    %72 = tpu.matmul %61, %66, %cst_27 {dimension_numbers = #tpu.dot_dimension_numbers<[1], [1], [0], [0], [0, 0, 1, 0], [], []>} : vector<64x8xf32>, vector<64x8xf32>, vector<64x64xf32> -> vector<64x64xf32>
    %73 = arith.addf %72, %19 : vector<64x64xf32>
    %cst_28 = arith.constant dense<0xFF800000> : vector<64xf32>
    %74 = vector.multi_reduction <maximumf>, %73, %cst_28 [1] : vector<64x64xf32> to vector<64xf32>
    %75 = vector.shape_cast %74 : vector<64xf32> to vector<64x1xf32>
    %76 = vector.broadcast %75 : vector<64x1xf32> to vector<64x64xf32>
    %77 = arith.subf %73, %76 : vector<64x64xf32>
    %78 = math.exp %77 : vector<64x64xf32>
    %cst_29 = arith.constant dense<0.000000e+00> : vector<64xf32>
    %79 = vector.multi_reduction <add>, %78, %cst_29 [1] : vector<64x64xf32> to vector<64xf32>
    %80 = vector.shape_cast %79 : vector<64xf32> to vector<64x1xf32>
    %81 = tpu.reciprocal %80 {approx = true} : vector<64x1xf32> -> vector<64x1xf32>
    %82 = vector.broadcast %81 : vector<64x1xf32> to vector<64x64xf32>
    %83 = arith.mulf %78, %82 : vector<64x64xf32>
    %cst_30 = arith.constant dense<0.000000e+00> : vector<64x8xf32>
    %84 = tpu.matmul %83, %71, %cst_30 {dimension_numbers = #tpu.dot_dimension_numbers<[1], [0], [0], [1], [0, 0, 1, 1], [], []>} : vector<64x64xf32>, vector<64x8xf32>, vector<64x8xf32> -> vector<64x8xf32>
    %85 = vector.extract_strided_slice %84 {offsets = [0, 0], sizes = [16, 8], strides = [1, 1]} : vector<64x8xf32> to vector<16x8xf32>
    %86 = vector.extract_strided_slice %84 {offsets = [16, 0], sizes = [16, 8], strides = [1, 1]} : vector<64x8xf32> to vector<16x8xf32>
    %87 = vector.extract_strided_slice %84 {offsets = [32, 0], sizes = [16, 8], strides = [1, 1]} : vector<64x8xf32> to vector<16x8xf32>
    %88 = vector.extract_strided_slice %84 {offsets = [48, 0], sizes = [16, 8], strides = [1, 1]} : vector<64x8xf32> to vector<16x8xf32>
    %89 = tpu.concatenate %85, %86, %87, %88 in 1 : vector<16x8xf32>, vector<16x8xf32>, vector<16x8xf32>, vector<16x8xf32> -> vector<16x32xf32>
    %cst_31 = arith.constant dense<0.000000e+00> : vector<16x32xf32>
    %90 = tpu.matmul %89, %26, %cst_31 {dimension_numbers = #tpu.dot_dimension_numbers<[1], [0], [0], [1], [0, 0, 1, 1], [], []>} : vector<16x32xf32>, vector<32x32xf32>, vector<16x32xf32> -> vector<16x32xf32>
    %91 = vector.broadcast %24 : vector<1x32xf32> to vector<16x32xf32>
    %92 = arith.addf %90, %91 : vector<16x32xf32>
    %93 = arith.addf %9, %92 : vector<16x32xf32>
    %cst_32 = arith.constant dense<0.000000e+00> : vector<16xf32>
    %94 = vector.multi_reduction <add>, %93, %cst_32 [1] : vector<16x32xf32> to vector<16xf32>
    %95 = vector.shape_cast %94 : vector<16xf32> to vector<16x1xf32>
    %cst_33 = arith.constant 3.200000e+01 : f32
    %96 = vector.broadcast %cst_33 : f32 to vector<16x1xf32>
    %97 = arith.divf %95, %96 : vector<16x1xf32>
    %98 = vector.broadcast %97 : vector<16x1xf32> to vector<16x32xf32>
    %99 = arith.subf %93, %98 : vector<16x32xf32>
    %100 = arith.mulf %99, %99 : vector<16x32xf32>
    %cst_34 = arith.constant dense<0.000000e+00> : vector<16xf32>
    %101 = vector.multi_reduction <add>, %100, %cst_34 [1] : vector<16x32xf32> to vector<16xf32>
    %102 = vector.shape_cast %101 : vector<16xf32> to vector<16x1xf32>
    %cst_35 = arith.constant 3.200000e+01 : f32
    %103 = vector.broadcast %cst_35 : f32 to vector<16x1xf32>
    %104 = arith.divf %102, %103 : vector<16x1xf32>
    %105 = vector.broadcast %97 : vector<16x1xf32> to vector<16x32xf32>
    %106 = arith.subf %93, %105 : vector<16x32xf32>
    %cst_36 = arith.constant 9.99999974E-6 : f32
    %107 = vector.broadcast %cst_36 : f32 to vector<16x1xf32>
    %108 = arith.addf %104, %107 : vector<16x1xf32>
    %109 = math.rsqrt %108 : vector<16x1xf32>
    %110 = vector.broadcast %109 : vector<16x1xf32> to vector<16x32xf32>
    %111 = arith.mulf %106, %110 : vector<16x32xf32>
    %112 = vector.broadcast %22 : vector<1x32xf32> to vector<16x32xf32>
    %113 = arith.mulf %111, %112 : vector<16x32xf32>
    %114 = vector.broadcast %23 : vector<1x32xf32> to vector<16x32xf32>
    %115 = arith.addf %113, %114 : vector<16x32xf32>
    %cst_37 = arith.constant dense<0.000000e+00> : vector<16x128xf32>
    %116 = tpu.matmul %115, %30, %cst_37 {dimension_numbers = #tpu.dot_dimension_numbers<[1], [0], [0], [1], [0, 0, 1, 1], [], []>} : vector<16x32xf32>, vector<32x128xf32>, vector<16x128xf32> -> vector<16x128xf32>
    %117 = vector.broadcast %31 : vector<1x128xf32> to vector<16x128xf32>
    %118 = arith.addf %116, %117 : vector<16x128xf32>
    %cst_38 = arith.constant 0.000000e+00 : f32
    %119 = vector.broadcast %cst_38 : f32 to vector<16x128xf32>
    %120 = arith.maximumf %118, %119 : vector<16x128xf32>
    %cst_39 = arith.constant dense<0.000000e+00> : vector<16x32xf32>
    %121 = tpu.matmul %120, %27, %cst_39 {dimension_numbers = #tpu.dot_dimension_numbers<[1], [0], [0], [1], [0, 0, 1, 1], [], []>} : vector<16x128xf32>, vector<128x32xf32>, vector<16x32xf32> -> vector<16x32xf32>
    %122 = arith.addf %93, %121 : vector<16x32xf32>
    %123 = vector.broadcast %25 : vector<1x32xf32> to vector<16x32xf32>
    %124 = arith.addf %122, %123 : vector<16x32xf32>
    %c248 = arith.constant 248 : index
    %c0_40 = arith.constant 0 : index
    %125 = vector.load %arg2[%c248, %c0_40] : memref<424x32xf32, #tpu.memory_space<vmem>>, vector<1x32xf32>
    %c249 = arith.constant 249 : index
    %c0_41 = arith.constant 0 : index
    %126 = vector.load %arg2[%c249, %c0_41] : memref<424x32xf32, #tpu.memory_space<vmem>>, vector<1x32xf32>
    %c250 = arith.constant 250 : index
    %c0_42 = arith.constant 0 : index
    %127 = vector.load %arg2[%c250, %c0_42] : memref<424x32xf32, #tpu.memory_space<vmem>>, vector<1x32xf32>
    %c251 = arith.constant 251 : index
    %c0_43 = arith.constant 0 : index
    %128 = vector.load %arg2[%c251, %c0_43] : memref<424x32xf32, #tpu.memory_space<vmem>>, vector<1x32xf32>
    %c252 = arith.constant 252 : index
    %c0_44 = arith.constant 0 : index
    %129 = vector.load %arg2[%c252, %c0_44] : memref<424x32xf32, #tpu.memory_space<vmem>>, vector<1x32xf32>
    %c253 = arith.constant 253 : index
    %c0_45 = arith.constant 0 : index
    %130 = vector.load %arg2[%c253, %c0_45] : memref<424x32xf32, #tpu.memory_space<vmem>>, vector<1x32xf32>
    %c256 = arith.constant 256 : index
    %c0_46 = arith.constant 0 : index
    %131 = vector.load %arg2[%c256, %c0_46] : memref<424x32xf32, #tpu.memory_space<vmem>>, vector<32x32xf32>
    %c288 = arith.constant 288 : index
    %c0_47 = arith.constant 0 : index
    %132 = vector.load %arg2[%c288, %c0_47] : memref<424x32xf32, #tpu.memory_space<vmem>>, vector<128x32xf32>
    %c72 = arith.constant 72 : index
    %c0_48 = arith.constant 0 : index
    %133 = vector.load %arg3[%c72, %c0_48] : memref<176x128xf32, #tpu.memory_space<vmem>>, vector<32x96xf32>
    %c136 = arith.constant 136 : index
    %c0_49 = arith.constant 0 : index
    %134 = vector.load %arg3[%c136, %c0_49] : memref<176x128xf32, #tpu.memory_space<vmem>>, vector<1x96xf32>
    %c104 = arith.constant 104 : index
    %c0_50 = arith.constant 0 : index
    %135 = vector.load %arg3[%c104, %c0_50] : memref<176x128xf32, #tpu.memory_space<vmem>>, vector<32x128xf32>
    %c137 = arith.constant 137 : index
    %c0_51 = arith.constant 0 : index
    %136 = vector.load %arg3[%c137, %c0_51] : memref<176x128xf32, #tpu.memory_space<vmem>>, vector<1x128xf32>
    %cst_52 = arith.constant dense<0.000000e+00> : vector<16xf32>
    %137 = vector.multi_reduction <add>, %124, %cst_52 [1] : vector<16x32xf32> to vector<16xf32>
    %138 = vector.shape_cast %137 : vector<16xf32> to vector<16x1xf32>
    %cst_53 = arith.constant 3.200000e+01 : f32
    %139 = vector.broadcast %cst_53 : f32 to vector<16x1xf32>
    %140 = arith.divf %138, %139 : vector<16x1xf32>
    %141 = vector.broadcast %140 : vector<16x1xf32> to vector<16x32xf32>
    %142 = arith.subf %124, %141 : vector<16x32xf32>
    %143 = arith.mulf %142, %142 : vector<16x32xf32>
    %cst_54 = arith.constant dense<0.000000e+00> : vector<16xf32>
    %144 = vector.multi_reduction <add>, %143, %cst_54 [1] : vector<16x32xf32> to vector<16xf32>
    %145 = vector.shape_cast %144 : vector<16xf32> to vector<16x1xf32>
    %cst_55 = arith.constant 3.200000e+01 : f32
    %146 = vector.broadcast %cst_55 : f32 to vector<16x1xf32>
    %147 = arith.divf %145, %146 : vector<16x1xf32>
    %148 = vector.broadcast %140 : vector<16x1xf32> to vector<16x32xf32>
    %149 = arith.subf %124, %148 : vector<16x32xf32>
    %cst_56 = arith.constant 9.99999974E-6 : f32
    %150 = vector.broadcast %cst_56 : f32 to vector<16x1xf32>
    %151 = arith.addf %147, %150 : vector<16x1xf32>
    %152 = math.rsqrt %151 : vector<16x1xf32>
    %153 = vector.broadcast %152 : vector<16x1xf32> to vector<16x32xf32>
    %154 = arith.mulf %149, %153 : vector<16x32xf32>
    %155 = vector.broadcast %125 : vector<1x32xf32> to vector<16x32xf32>
    %156 = arith.mulf %154, %155 : vector<16x32xf32>
    %157 = vector.broadcast %126 : vector<1x32xf32> to vector<16x32xf32>
    %158 = arith.addf %156, %157 : vector<16x32xf32>
    %cst_57 = arith.constant dense<0.000000e+00> : vector<16x96xf32>
    %159 = tpu.matmul %158, %133, %cst_57 {dimension_numbers = #tpu.dot_dimension_numbers<[1], [0], [0], [1], [0, 0, 1, 1], [], []>} : vector<16x32xf32>, vector<32x96xf32>, vector<16x96xf32> -> vector<16x96xf32>
    %160 = vector.broadcast %134 : vector<1x96xf32> to vector<16x96xf32>
    %161 = arith.addf %159, %160 : vector<16x96xf32>
    %162 = vector.extract_strided_slice %161 {offsets = [0, 0], sizes = [16, 8], strides = [1, 1]} : vector<16x96xf32> to vector<16x8xf32>
    %163 = vector.extract_strided_slice %161 {offsets = [0, 8], sizes = [16, 8], strides = [1, 1]} : vector<16x96xf32> to vector<16x8xf32>
    %164 = vector.extract_strided_slice %161 {offsets = [0, 16], sizes = [16, 8], strides = [1, 1]} : vector<16x96xf32> to vector<16x8xf32>
    %165 = vector.extract_strided_slice %161 {offsets = [0, 24], sizes = [16, 8], strides = [1, 1]} : vector<16x96xf32> to vector<16x8xf32>
    %166 = tpu.concatenate %162, %163, %164, %165 in 0 : vector<16x8xf32>, vector<16x8xf32>, vector<16x8xf32>, vector<16x8xf32> -> vector<64x8xf32>
    %167 = vector.extract_strided_slice %161 {offsets = [0, 32], sizes = [16, 8], strides = [1, 1]} : vector<16x96xf32> to vector<16x8xf32>
    %168 = vector.extract_strided_slice %161 {offsets = [0, 40], sizes = [16, 8], strides = [1, 1]} : vector<16x96xf32> to vector<16x8xf32>
    %169 = vector.extract_strided_slice %161 {offsets = [0, 48], sizes = [16, 8], strides = [1, 1]} : vector<16x96xf32> to vector<16x8xf32>
    %170 = vector.extract_strided_slice %161 {offsets = [0, 56], sizes = [16, 8], strides = [1, 1]} : vector<16x96xf32> to vector<16x8xf32>
    %171 = tpu.concatenate %167, %168, %169, %170 in 0 : vector<16x8xf32>, vector<16x8xf32>, vector<16x8xf32>, vector<16x8xf32> -> vector<64x8xf32>
    %172 = vector.extract_strided_slice %161 {offsets = [0, 64], sizes = [16, 8], strides = [1, 1]} : vector<16x96xf32> to vector<16x8xf32>
    %173 = vector.extract_strided_slice %161 {offsets = [0, 72], sizes = [16, 8], strides = [1, 1]} : vector<16x96xf32> to vector<16x8xf32>
    %174 = vector.extract_strided_slice %161 {offsets = [0, 80], sizes = [16, 8], strides = [1, 1]} : vector<16x96xf32> to vector<16x8xf32>
    %175 = vector.extract_strided_slice %161 {offsets = [0, 88], sizes = [16, 8], strides = [1, 1]} : vector<16x96xf32> to vector<16x8xf32>
    %176 = tpu.concatenate %172, %173, %174, %175 in 0 : vector<16x8xf32>, vector<16x8xf32>, vector<16x8xf32>, vector<16x8xf32> -> vector<64x8xf32>
    %cst_58 = arith.constant dense<0.000000e+00> : vector<64x64xf32>
    %177 = tpu.matmul %166, %171, %cst_58 {dimension_numbers = #tpu.dot_dimension_numbers<[1], [1], [0], [0], [0, 0, 1, 0], [], []>} : vector<64x8xf32>, vector<64x8xf32>, vector<64x64xf32> -> vector<64x64xf32>
    %178 = arith.addf %177, %19 : vector<64x64xf32>
    %cst_59 = arith.constant dense<0xFF800000> : vector<64xf32>
    %179 = vector.multi_reduction <maximumf>, %178, %cst_59 [1] : vector<64x64xf32> to vector<64xf32>
    %180 = vector.shape_cast %179 : vector<64xf32> to vector<64x1xf32>
    %181 = vector.broadcast %180 : vector<64x1xf32> to vector<64x64xf32>
    %182 = arith.subf %178, %181 : vector<64x64xf32>
    %183 = math.exp %182 : vector<64x64xf32>
    %cst_60 = arith.constant dense<0.000000e+00> : vector<64xf32>
    %184 = vector.multi_reduction <add>, %183, %cst_60 [1] : vector<64x64xf32> to vector<64xf32>
    %185 = vector.shape_cast %184 : vector<64xf32> to vector<64x1xf32>
    %186 = tpu.reciprocal %185 {approx = true} : vector<64x1xf32> -> vector<64x1xf32>
    %187 = vector.broadcast %186 : vector<64x1xf32> to vector<64x64xf32>
    %188 = arith.mulf %183, %187 : vector<64x64xf32>
    %cst_61 = arith.constant dense<0.000000e+00> : vector<64x8xf32>
    %189 = tpu.matmul %188, %176, %cst_61 {dimension_numbers = #tpu.dot_dimension_numbers<[1], [0], [0], [1], [0, 0, 1, 1], [], []>} : vector<64x64xf32>, vector<64x8xf32>, vector<64x8xf32> -> vector<64x8xf32>
    %190 = vector.extract_strided_slice %189 {offsets = [0, 0], sizes = [16, 8], strides = [1, 1]} : vector<64x8xf32> to vector<16x8xf32>
    %191 = vector.extract_strided_slice %189 {offsets = [16, 0], sizes = [16, 8], strides = [1, 1]} : vector<64x8xf32> to vector<16x8xf32>
    %192 = vector.extract_strided_slice %189 {offsets = [32, 0], sizes = [16, 8], strides = [1, 1]} : vector<64x8xf32> to vector<16x8xf32>
    %193 = vector.extract_strided_slice %189 {offsets = [48, 0], sizes = [16, 8], strides = [1, 1]} : vector<64x8xf32> to vector<16x8xf32>
    %194 = tpu.concatenate %190, %191, %192, %193 in 1 : vector<16x8xf32>, vector<16x8xf32>, vector<16x8xf32>, vector<16x8xf32> -> vector<16x32xf32>
    %cst_62 = arith.constant dense<0.000000e+00> : vector<16x32xf32>
    %195 = tpu.matmul %194, %131, %cst_62 {dimension_numbers = #tpu.dot_dimension_numbers<[1], [0], [0], [1], [0, 0, 1, 1], [], []>} : vector<16x32xf32>, vector<32x32xf32>, vector<16x32xf32> -> vector<16x32xf32>
    %196 = vector.broadcast %129 : vector<1x32xf32> to vector<16x32xf32>
    %197 = arith.addf %195, %196 : vector<16x32xf32>
    %198 = arith.addf %124, %197 : vector<16x32xf32>
    %cst_63 = arith.constant dense<0.000000e+00> : vector<16xf32>
    %199 = vector.multi_reduction <add>, %198, %cst_63 [1] : vector<16x32xf32> to vector<16xf32>
    %200 = vector.shape_cast %199 : vector<16xf32> to vector<16x1xf32>
    %cst_64 = arith.constant 3.200000e+01 : f32
    %201 = vector.broadcast %cst_64 : f32 to vector<16x1xf32>
    %202 = arith.divf %200, %201 : vector<16x1xf32>
    %203 = vector.broadcast %202 : vector<16x1xf32> to vector<16x32xf32>
    %204 = arith.subf %198, %203 : vector<16x32xf32>
    %205 = arith.mulf %204, %204 : vector<16x32xf32>
    %cst_65 = arith.constant dense<0.000000e+00> : vector<16xf32>
    %206 = vector.multi_reduction <add>, %205, %cst_65 [1] : vector<16x32xf32> to vector<16xf32>
    %207 = vector.shape_cast %206 : vector<16xf32> to vector<16x1xf32>
    %cst_66 = arith.constant 3.200000e+01 : f32
    %208 = vector.broadcast %cst_66 : f32 to vector<16x1xf32>
    %209 = arith.divf %207, %208 : vector<16x1xf32>
    %210 = vector.broadcast %202 : vector<16x1xf32> to vector<16x32xf32>
    %211 = arith.subf %198, %210 : vector<16x32xf32>
    %cst_67 = arith.constant 9.99999974E-6 : f32
    %212 = vector.broadcast %cst_67 : f32 to vector<16x1xf32>
    %213 = arith.addf %209, %212 : vector<16x1xf32>
    %214 = math.rsqrt %213 : vector<16x1xf32>
    %215 = vector.broadcast %214 : vector<16x1xf32> to vector<16x32xf32>
    %216 = arith.mulf %211, %215 : vector<16x32xf32>
    %217 = vector.broadcast %127 : vector<1x32xf32> to vector<16x32xf32>
    %218 = arith.mulf %216, %217 : vector<16x32xf32>
    %219 = vector.broadcast %128 : vector<1x32xf32> to vector<16x32xf32>
    %220 = arith.addf %218, %219 : vector<16x32xf32>
    %cst_68 = arith.constant dense<0.000000e+00> : vector<16x128xf32>
    %221 = tpu.matmul %220, %135, %cst_68 {dimension_numbers = #tpu.dot_dimension_numbers<[1], [0], [0], [1], [0, 0, 1, 1], [], []>} : vector<16x32xf32>, vector<32x128xf32>, vector<16x128xf32> -> vector<16x128xf32>
    %222 = vector.broadcast %136 : vector<1x128xf32> to vector<16x128xf32>
    %223 = arith.addf %221, %222 : vector<16x128xf32>
    %cst_69 = arith.constant 0.000000e+00 : f32
    %224 = vector.broadcast %cst_69 : f32 to vector<16x128xf32>
    %225 = arith.maximumf %223, %224 : vector<16x128xf32>
    %cst_70 = arith.constant dense<0.000000e+00> : vector<16x32xf32>
    %226 = tpu.matmul %225, %132, %cst_70 {dimension_numbers = #tpu.dot_dimension_numbers<[1], [0], [0], [1], [0, 0, 1, 1], [], []>} : vector<16x128xf32>, vector<128x32xf32>, vector<16x32xf32> -> vector<16x32xf32>
    %227 = arith.addf %198, %226 : vector<16x32xf32>
    %228 = vector.broadcast %130 : vector<1x32xf32> to vector<16x32xf32>
    %229 = arith.addf %227, %228 : vector<16x32xf32>
    %c416 = arith.constant 416 : index
    %c0_71 = arith.constant 0 : index
    %230 = vector.load %arg2[%c416, %c0_71] : memref<424x32xf32, #tpu.memory_space<vmem>>, vector<1x32xf32>
    %c417 = arith.constant 417 : index
    %c0_72 = arith.constant 0 : index
    %231 = vector.load %arg2[%c417, %c0_72] : memref<424x32xf32, #tpu.memory_space<vmem>>, vector<1x32xf32>
    %cst_73 = arith.constant dense<0.000000e+00> : vector<16xf32>
    %232 = vector.multi_reduction <add>, %229, %cst_73 [1] : vector<16x32xf32> to vector<16xf32>
    %233 = vector.shape_cast %232 : vector<16xf32> to vector<16x1xf32>
    %cst_74 = arith.constant 3.200000e+01 : f32
    %234 = vector.broadcast %cst_74 : f32 to vector<16x1xf32>
    %235 = arith.divf %233, %234 : vector<16x1xf32>
    %236 = vector.broadcast %235 : vector<16x1xf32> to vector<16x32xf32>
    %237 = arith.subf %229, %236 : vector<16x32xf32>
    %238 = arith.mulf %237, %237 : vector<16x32xf32>
    %cst_75 = arith.constant dense<0.000000e+00> : vector<16xf32>
    %239 = vector.multi_reduction <add>, %238, %cst_75 [1] : vector<16x32xf32> to vector<16xf32>
    %240 = vector.shape_cast %239 : vector<16xf32> to vector<16x1xf32>
    %cst_76 = arith.constant 3.200000e+01 : f32
    %241 = vector.broadcast %cst_76 : f32 to vector<16x1xf32>
    %242 = arith.divf %240, %241 : vector<16x1xf32>
    %243 = vector.broadcast %235 : vector<16x1xf32> to vector<16x32xf32>
    %244 = arith.subf %229, %243 : vector<16x32xf32>
    %cst_77 = arith.constant 9.99999974E-6 : f32
    %245 = vector.broadcast %cst_77 : f32 to vector<16x1xf32>
    %246 = arith.addf %242, %245 : vector<16x1xf32>
    %247 = math.rsqrt %246 : vector<16x1xf32>
    %248 = vector.broadcast %247 : vector<16x1xf32> to vector<16x32xf32>
    %249 = arith.mulf %244, %248 : vector<16x32xf32>
    %250 = vector.broadcast %230 : vector<1x32xf32> to vector<16x32xf32>
    %251 = arith.mulf %249, %250 : vector<16x32xf32>
    %252 = vector.broadcast %231 : vector<1x32xf32> to vector<16x32xf32>
    %253 = arith.addf %251, %252 : vector<16x32xf32>
    %c144 = arith.constant 144 : index
    %c0_78 = arith.constant 0 : index
    %254 = vector.load %arg3[%c144, %c0_78] : memref<176x128xf32, #tpu.memory_space<vmem>>, vector<32x128xf32>
    %cst_79 = arith.constant dense<0.000000e+00> : vector<16x128xf32>
    %255 = tpu.matmul %253, %254, %cst_79 {dimension_numbers = #tpu.dot_dimension_numbers<[1], [0], [0], [1], [0, 0, 1, 1], [], []>} : vector<16x32xf32>, vector<32x128xf32>, vector<16x128xf32> -> vector<16x128xf32>
    %c0_80 = arith.constant 0 : index
    %c0_81 = arith.constant 0 : index
    %256 = vector.load %arg4[%c0_80, %c0_81] : memref<16x128xf32, #tpu.memory_space<vmem>>, vector<16x128xf32>
    tpu.vector_store %arg4[%c0_80, %c0_81], %255 {strides = array<i32>} : memref<16x128xf32, #tpu.memory_space<vmem>>, vector<16x128xf32>,
    return
  }
  func.func @transform_0(%arg0: i32) -> (i32, i32) {
    %c0_i32 = arith.constant 0 : i32
    %c0_i32_0 = arith.constant 0 : i32
    %c0_i32_1 = arith.constant 0 : i32
    return %c0_i32, %c0_i32_0 : i32, i32
  }
  func.func @transform_1(%arg0: i32) -> (i32, i32) {
    %c0_i32 = arith.constant 0 : i32
    %c0_i32_0 = arith.constant 0 : i32
    %c0_i32_1 = arith.constant 0 : i32
    return %c0_i32, %c0_i32_0 : i32, i32
  }
  func.func @transform_2(%arg0: i32) -> (i32, i32) {
    %c0_i32 = arith.constant 0 : i32
    %c0_i32_0 = arith.constant 0 : i32
    %c0_i32_1 = arith.constant 0 : i32
    return %c0_i32, %c0_i32_0 : i32, i32
  }
  func.func @transform_3(%arg0: i32) -> (i32, i32) {
    %c0_i32 = arith.constant 0 : i32
    %c0_i32_0 = arith.constant 0 : i32
    %c0_i32_1 = arith.constant 0 : i32
    return %c0_i32, %c0_i32_0 : i32, i32
  }
}

</mosaic_0001>

<bundles_post_ra>
// kernel: tpu_custom_call.1
= control target key start
LH: loop header
LB: loop body
LE: loop exit
PB: predicated region body
PF: predicated region fallthrough
CT: control target
= control target key end

     0   :  { %v3021_v2 = vmov 0   ;;  %s3696_s0 = inlined_call_operand.vmem [shape: s32[16,1], index: 0, kind: input, shape index: {}]   ;;  %s3697_s1 = inlined_call_operand.vmem [shape: f32[424,32], index: 1, kind: input, shape index: {}]   ;;  %s3698_s2 = inlined_call_operand.vmem [shape: f32[176,128], index: 2, kind: input, shape index: {}]   ;;  %s3699_s3 = inlined_call_operand.hbm [shape: f32[16,128], index: 3, kind: output, shape index: {}]  }
   0x1   :  { %v15_v0 = vld [vmem:[%s3696_s0] sm:$0xff]  ;;  %2832 = vset.pattern.permute.xlu0 %v3021_v2  ;;  %v32_v3 = vld [vmem:[%s3697_s1 + $0x8] sm:$0xff]  ;;  %v33_v4 = vld [vmem:[%s3697_s1 + $0x10] sm:$0xff] }
   0x2   :  { %v31_v1 = vld [vmem:[%s3697_s1] sm:$0xff]  ;;  %v34_v5 = vld [vmem:[%s3697_s1 + $0x18] sm:$0xff]  ;;  %20 = vperm.xlu0 %2832, %v15_v0   ;;  %v16_v6 = vld [vmem:[%s3696_s0 + $0x8] sm:$0xff] }
   0x3   :  { %v2603_v7 = vpack.c.bf16 %v32_v3, %v31_v1  ;;  %v2607_v8 = vpack.c.bf16 %v34_v5, %v33_v4  ;;  %v35_v9 = vld [vmem:[%s3697_s1 + $0x20] sm:$0xff]  ;;  %v36_v10 = vld [vmem:[%s3697_s1 + $0x28] sm:$0xff] }
   0x4   :  { %8 = vsyncpa [#allocation3], 0  ;;  %v2611_v11 = vpack.c.bf16 %v36_v10, %v35_v9  ;;  %v37_v12 = vld [vmem:[%s3697_s1 + $0x30] sm:$0xff]  ;;  %v38_v13 = vld [vmem:[%s3697_s1 + $0x38] sm:$0xff]  ;;  %v17_v15 = vlaneseq  ;;  %vm41_vm0 = vcmask 523264   ;;  %v3022_v18 = vmov 0.0  }
   0x5   :  { %2604 = vmatprep.subr.bf16.mxu0 %v2603_v7  ;;  %v2615_v14 = vpack.c.bf16 %v38_v13, %v37_v12  ;;  %v39_v22 = vld [vmem:[%s3697_s1 + $0x40] sm:$0xff]  ;;  %v40_v24 = vld [vmem:[%s3697_s1 + $0x48] sm:$0xff]  ;;  %vm193_vm3 = vcmask 261120   ;;  %v185_v43 = vld [vmem:[%s3698_s2 + $0x10] sm:$0xff]  ;;  %vm348_vm4 = vcmask 64512   ;;  %s3023_s22 = smov 120  }
   0x6   :  { %2606 = vmatpush3.bf16.msra.mxu0 %v2603_v7  ;;  %23 = vperm.xlu0 %2832, %v16_v6   ;;  %v3085_v16 = vand.u32 127, %v17_v15  ;;  %v183_v40 = vld [vmem:[%s3698_s2] sm:$0xff]  ;;  %v184_v41 = vld [vmem:[%s3698_s2 + $0x8] sm:$0xff]  ;;  %v186_v44 = vld [vmem:[%s3698_s2 + $0x18] sm:$0xff]  ;;  %s3024_s23 = smov 104   ;;  %s3025_s24 = smov 112  }
   0x7   :  { %2608 = vmatprep.subr.bf16.mxu0 %v2607_v8  ;;  %v2619_v42 = vpack.c.bf16 %v184_v41, %v183_v40  ;;  %v2623_v45 = vpack.c.bf16 %v186_v44, %v185_v43  ;;  %v2093_v53 = vld [vmem:[%s3697_s1 + $0x50] ss:$0 sm:$0xff]  ;;  %v2094_v55 = vld [vmem:[%s3697_s1 + $0x51] ss:$0 sm:$0xff]  ;;  %v2095_v62 = vld [vmem:[%s3698_s2 + $0x40] ss:$0 sm:$0xff] }
   0x8   :  { %s3026_s25 = smov 96   ;;  %vm3157_vm5 = vmpackc.low %vm348_vm4, %vm348_vm4  ;;  %v3027_v43 = vmov -1e+30   ;;  %s3028_s26 = smov 64   ;;  %vm753_vm14 = vcmask 130048   ;;  %vm756_vm15 = vcmask 195584  }
   0x9   :  { %s3029_s7 = smov 8   ;;  %s3030_s8 = smov 16  }
   0xa   :  { %2610 = vmatpush3.bf16.msra.mxu0 %v2607_v8  ;;  %s3031_s9 = smov 24   ;;  %s3032_s27 = smov [#allocation2]  }
   0xb   :  { %2612 = vmatprep.subr.bf16.mxu0 %v2611_v11  ;;  %s2078_s28 = sshll.u32 %s3032_s27, 4  ;;  %s2079_s28 = int_to_ptr.vmem [resolvable:$true] %s2078_s28 }
   0xc   :  { %s2997_s29 = scalar_lea.vmem %s2079_s28, 256  ;;  %p3002_p1 = scmp.lt.s32.totalorder %s2079_s28, %s2079_s28 }
   0xd   :  { %p2998_p0 = scmp.ne.s32.totalorder %s2079_s28, %s2997_s29  ;;  %p3003_p2 = scmp.lt.s32.totalorder %s2997_s29, %s2997_s29 }
   0xe   :  { %2614 = vmatpush3.bf16.msra.mxu0 %v2611_v11 }
   0xf   :  { %2616 = vmatprep.subr.bf16.mxu0 %v2615_v14  ;;  %p3004_p3 = por %p3003_p2, %p3002_p1 }
  0x11   :  { %p3005_p4 = pnand %p3004_p3, %p2998_p0 }
  0x12   :  { %2618 = vmatpush3.bf16.msra.mxu0 %v2615_v14 }
  0x13   :  { %2620 = vmatprep.subr.bf16.mxu0 %v2619_v42 }
  0x81   :  { %v21_v17 = vpop.permute.xlu0 %20 }
  0x82   :  { %vm25_vm1 = vcmp.eq.s32.totalorder %v3085_v16, %v21_v17 }
  0x83   :  { %v2089_v19 = vsel %vm25_vm1, 1.0, %v3022_v18 }
  0x84   :  { %2341 = vmatprep.mubr.msk.f32.mxu0 %vm41_vm0, %v2089_v19 }
  0x85   :  { %v24_v20 = vpop.permute.xlu0 %23 }
  0x86   :  { %vm26_vm2 = vcmp.eq.s32.totalorder %v3085_v16, %v24_v20 }
  0x87   :  { %v2090_v21 = vsel %vm26_vm2, 1.0, %v3022_v18 }
  0x88   :  { %2342 = vmatmul.mubr.msk.f32.vlgmr.msra.gmra.mrb[0].mxu0 %vm41_vm0, %v2090_v21 }
  0x89   :  { %2622 = vmatpush3.bf16.msra.mxu0 %v2619_v42 }
  0x8a   :  { %2624 = vmatprep.subr.bf16.mxu0 %v2623_v45 }
  0x8d   :  { %2626 = vmatpush3.bf16.msra.mxu0 %v2623_v45 }
 0x15b   :  { %v2343_v23 = vpop.f32.mrb[0].mxu0 }
 0x15c   :  { %v114_v25 = vpop.f32.mrb[1].mxu0  ;;  %v3099_v27 = vadd.f32 %v2343_v23, %v40_v24 }
 0x15d   :  { %v3097_v26 = vadd.f32 %v114_v25, %v39_v22 }
 0x15e   :  { %v197_v29 = vsel %vm193_vm3, %v3099_v27, 0.0 }
 0x15f   :  { %v194_v28 = vsel %vm193_vm3, %v3097_v26, 0.0 }
 0x160   :  { %195 = vadd.xlane.f32.xlu1 %v194_v28 }
 0x164   :  { %198 = vadd.xlane.f32.xlu1 %v197_v29 }
 0x1ed   :  { %v196_v30 = vpop.xlane.xlu1 %195 }
 0x1ee   :  { %v201_v31 = vmul.f32 0.03125, %v196_v30 }
 0x1f0   :  { %v203_v32 = vsub.f32 %v3097_v26, %v201_v31 }
 0x1f1   :  { %v199_v33 = vpop.xlane.xlu1 %198 }
 0x1f2   :  { %v202_v34 = vmul.f32 0.03125, %v199_v33  ;;  %v205_v35 = vmul.f32 %v203_v32, %v203_v32 }
 0x1f4   :  { %v204_v36 = vsub.f32 %v3099_v27, %v202_v34  ;;  %v207_v37 = vsel %vm193_vm3, %v205_v35, 0.0  ;;  %v124_v34 = vshrl.u32 %v17_v15, 7 }
 0x1f5   :  { %208 = vadd.xlane.f32.xlu0 %v207_v37 }
 0x1f6   :  { %v206_v38 = vmul.f32 %v204_v36, %v204_v36  ;;  %v125_v35 = vadd.s32 8, %v124_v34  ;;  %v127_v40 = vadd.s32 24, %v124_v34  ;;  %v128_v42 = vadd.s32 32, %v124_v34 }
 0x1f8   :  { %v210_v39 = vsel %vm193_vm3, %v206_v38, 0.0  ;;  %v133_v37 = vshra.s32 %v125_v35, 3  ;;  %v132_v38 = vshra.s32 %v124_v34, 3  ;;  %v135_v45 = vshra.s32 %v127_v40, 3 }
 0x1f9   :  { %211 = vadd.xlane.f32.xlu1 %v210_v39  ;;  %v126_v39 = vadd.s32 16, %v124_v34  ;;  %v136_v15 = vshra.s32 %v128_v42, 3 }
 0x1fb   :  { %v134_v41 = vshra.s32 %v126_v39, 3 }
 0x282   :  { %v209_v46 = vpop.xlane.xlu0 %208 }
 0x283   :  { %v213_v47 = vmul.f32 0.03125, %v209_v46  ;;  %v129_v46 = vadd.s32 40, %v124_v34 }
 0x285   :  { %v215_v48 = vadd.f32 1e-05, %v213_v47 }
 0x286   :  { %v212_v49 = vpop.xlane.xlu1 %211 }
 0x287   :  { %2913 = vrsqrt.f32 %v215_v48  ;;  %v214_v50 = vmul.f32 0.03125, %v212_v49  ;;  %v130_v49 = vadd.s32 48, %v124_v34 }
 0x289   :  { %v216_v51 = vadd.f32 1e-05, %v214_v50 }
 0x28b   :  { %2915 = vrsqrt.f32 %v216_v51 }
 0x291   :  { %v2914_v52 = vpop.eup %2913 }
 0x292   :  { %v219_v54 = vmul.f32 %v2914_v52, %v203_v32  ;;  %v137_v52 = vshra.s32 %v129_v46, 3 }
 0x294   :  { %v225_v56 = vmul.f32 %v2093_v53, %v219_v54 }
 0x295   :  { %v2916_v57 = vpop.eup %2915 }
 0x296   :  { %v220_v58 = vmul.f32 %v2916_v57, %v204_v36  ;;  %v231_v59 = vadd.f32 %v2094_v55, %v225_v56  ;;  %v140_v36 = vshra.s32 %v3085_v16, 3 }
 0x298   :  { %v226_v60 = vmul.f32 %v2093_v53, %v220_v58  ;;  %2352 = vmatprep.mubr.msk.f32.mxu0 %vm193_vm3, %v231_v59  ;;  %vm142_vm6 = vcmp.eq.s32.totalorder %v133_v37, %v140_v36  ;;  %vm141_vm7 = vcmp.eq.s32.totalorder %v132_v38, %v140_v36  ;;  %vm143_vm8 = vcmp.eq.s32.totalorder %v134_v41, %v140_v36 }
 0x299   :  { %v3186_v44 = vsel %vm142_vm6, 0.0, %v3027_v43  ;;  %v3188_v47 = vsel %vm141_vm7, 0.0, %v3027_v43  ;;  %vm144_vm9 = vcmp.eq.s32.totalorder %v135_v45, %v140_v36  ;;  %v131_v53 = vadd.s32 56, %v124_v34 }
 0x29a   :  { %v232_v61 = vadd.f32 %v2094_v55, %v226_v60  ;;  %v3193_v55 = vsel %vm143_vm8, 0.0, %v3027_v43  ;;  %vm145_vm10 = vcmp.eq.s32.totalorder %v136_v15, %v140_v36  ;;  %v138_v58 = vshra.s32 %v130_v49, 3 }
 0x29b   :  { %v3196_v59 = vsel %vm144_vm9, 0.0, %v3027_v43  ;;  %vm146_vm11 = vcmp.eq.s32.totalorder %v137_v52, %v140_v36 }
 0x29c   :  { %2353 = vmatmul.mubr.msk.f32.vlgmr.msra.gmra.mrb[2].mxu0 %vm193_vm3, %v232_v61  ;;  %vm147_vm12 = vcmp.eq.s32.totalorder %v138_v58, %v140_v36 }
 0x36f   :  { %v2354_v63 = vpop.f32.mrb[2].mxu0 }
 0x370   :  { %v315_v0 = vadd.f32 %v2354_v63, %v2095_v62  ;;  %v309_v1 = vpop.f32.mrb[3].mxu0  ;;  %v3199_v63 = vsel %vm145_vm10, 0.0, %v3027_v43 }
 0x371   :  { %v310_v2 = vadd.f32 %v2095_v62, %v309_v1  ;;  %v139_v62 = vshra.s32 %v131_v53, 3 }
 0x372   :  { %322 = vrot.lane.b32.xlu1 %v315_v0, %s3023_s22 }
 0x373   :  { %328 = vrot.lane.b32.xlu0 %v310_v2, %s3024_s23  ;;  %2371 = vmatprep.mubr.msk.f32.mxu1 %vm348_vm4, %v310_v2  ;;  %v3139_v3 = vpack.i.bf16 %v315_v0, %v310_v2  ;;  %vm148_vm13 = vcmp.eq.s32.totalorder %v139_v62, %v140_v36 }
 0x376   :  { %320 = vrot.lane.b32.xlu1 %v310_v2, %s3023_s22 }
 0x37a   :  { %324 = vrot.lane.b32.xlu1 %v310_v2, %s3025_s24 }
 0x37e   :  { %326 = vrot.lane.b32.xlu1 %v315_v0, %s3025_s24 }
 0x382   :  { %330 = vrot.lane.b32.xlu1 %v315_v0, %s3024_s23 }
 0x386   :  { %2834 = vrot.lane.b32.xlu1 %v3139_v3, %s3026_s25 }
 0x3e4   :  { %v323_v4 = vpop.permute.xlu1 %322 }
 0x3e5   :  { %v329_v10 = vpop.permute.xlu0 %328 }
 0x3e8   :  { %v321_v5 = vpop.permute.xlu1 %320 }
 0x3e9   :  { %v3143_v6 = vpack.i.bf16 %v323_v4, %v321_v5 }
 0x3eb   :  { %2839 = vrot.lane.b32.xlu1 %v3143_v6, %s3026_s25 }
 0x3ec   :  { %v325_v7 = vpop.permute.xlu1 %324 }
 0x3f0   :  { %v327_v8 = vpop.permute.xlu1 %326 }
 0x3f1   :  { %v3147_v9 = vpack.i.bf16 %v327_v8, %v325_v7 }
 0x3f3   :  { %2844 = vrot.lane.b32.xlu1 %v3147_v9, %s3026_s25 }
 0x3f4   :  { %v331_v11 = vpop.permute.xlu1 %330 }
 0x3f5   :  { %v3151_v12 = vpack.i.bf16 %v331_v11, %v329_v10 }
 0x3f7   :  { %2849 = vrot.lane.b32.xlu1 %v3151_v12, %s3026_s25 }
 0x3f8   :  { %v2835_v13 = vpop.permute.xlu1 %2834 }
 0x3f9   :  { %v2837_v14 = vunpack.i.h.bf16 %v2835_v13  ;;  %v2836_v17 = vunpack.i.l.bf16 %v2835_v13 }
 0x3fb   :  { %v2627_v19 = vpack.c.bf16 %v2837_v14, %v2836_v17  ;;  %v3211_v17 = vsel %vm148_vm13, 0.0, %v3027_v43 }
 0x3fd   :  { %2629 = vmatprep.subr.msk.bf16.mxu1 %vm3157_vm5, %v2627_v19 }
 0x3fe   :  { %2632 = vmatpush3.bf16.xpose.msk.msra.mxu1 %vm3157_vm5, %v2627_v19 }
 0x45d   :  { %v2840_v20 = vpop.permute.xlu1 %2839 }
 0x45e   :  { %v2842_v21 = vunpack.i.h.bf16 %v2840_v20  ;;  %v2841_v22 = vunpack.i.l.bf16 %v2840_v20 }
 0x460   :  { %v2633_v23 = vpack.c.bf16 %v2842_v21, %v2841_v22 }
 0x462   :  { %2635 = vmatprep.subr.msk.bf16.mxu1 %vm3157_vm5, %v2633_v23 }
 0x463   :  { %2638 = vmatpush3.bf16.xpose.msk.msra.mxu1 %vm3157_vm5, %v2633_v23 }
 0x465   :  { %v2845_v24 = vpop.permute.xlu1 %2844 }
 0x466   :  { %v2847_v25 = vunpack.i.h.bf16 %v2845_v24  ;;  %v2846_v28 = vunpack.i.l.bf16 %v2845_v24 }
 0x468   :  { %v2639_v29 = vpack.c.bf16 %v2847_v25, %v2846_v28 }
 0x469   :  { %v2850_v30 = vpop.permute.xlu1 %2849 }
 0x46a   :  { %v2852_v31 = vunpack.i.h.bf16 %v2850_v30  ;;  %v2851_v32 = vunpack.i.l.bf16 %v2850_v30  ;;  %2641 = vmatprep.subr.msk.bf16.mxu1 %vm3157_vm5, %v2639_v29 }
 0x46b   :  { %2644 = vmatpush3.bf16.xpose.msk.msra.mxu1 %vm3157_vm5, %v2639_v29 }
 0x46c   :  { %v2645_v33 = vpack.c.bf16 %v2852_v31, %v2851_v32 }
 0x46e   :  { %2647 = vmatprep.subr.msk.bf16.mxu1 %vm3157_vm5, %v2645_v33 }
 0x473   :  { %2650 = vmatpush3.bf16.xpose.msk.msra.mxu1 %vm3157_vm5, %v2645_v33 }
 0x47a   :  { %2372 = vmatmul.mubr.msk.f32.vlgmr.msra.gmra.mrb[0].mxu1 %vm348_vm4, %v315_v0 }
 0x47b   :  { %2374 = vmatprep.mubr.msk.f32.mxu1 %vm348_vm4, %v321_v5 }
 0x47e   :  { %2375 = vmatmul.mubr.msk.f32.gmra.mrb[2].mxu1 %vm348_vm4, %v323_v4  ;;  %v3203_v4 = vsel %vm146_vm11, 0.0, %v3027_v43 }
 0x47f   :  { %2377 = vmatprep.mubr.msk.f32.mxu1 %vm348_vm4, %v325_v7 }
 0x482   :  { %2378 = vmatmul.mubr.msk.f32.gmra.mrb[4].mxu1 %vm348_vm4, %v327_v8  ;;  %v3206_v8 = vsel %vm147_vm12, 0.0, %v3027_v43 }
 0x483   :  { %2380 = vmatprep.mubr.msk.f32.mxu1 %vm348_vm4, %v329_v10 }
 0x486   :  { %2381 = vmatmul.mubr.msk.f32.gmra.mrb[6].mxu1 %vm348_vm4, %v331_v11 }
 0x54d   :  { %v2373_v48 = vpop.f32.mrb[0].mxu1 }
 0x54e   :  { %v453_v16 = vadd.f32 %v2373_v48, %v3186_v44  ;;  %v447_v50 = vpop.f32.mrb[1].mxu1 }
 0x54f   :  { %v448_v51 = vadd.f32 %v447_v50, %v3188_v47 }
 0x550   :  { %v489_v54 = vsel %vm41_vm0, %v453_v16, -inf }
 0x551   :  { %490 = vmax.xlane.f32.xlu1 %v489_v54  ;;  %v2376_v56 = vpop.f32.mrb[2].mxu1  ;;  %v486_v57 = vsel %vm41_vm0, %v448_v51, -inf }
 0x552   :  { %v457_v60 = vpop.f32.mrb[3].mxu1  ;;  %487 = vmax.xlane.f32.xlu0 %v486_v57  ;;  %v463_v0 = vadd.f32 %v2376_v56, %v3196_v59 }
 0x553   :  { %v458_v61 = vadd.f32 %v457_v60, %v3193_v55 }
 0x554   :  { %v495_v14 = vsel %vm41_vm0, %v463_v0, -inf }
 0x555   :  { %v2379_v1 = vpop.f32.mrb[4].mxu1  ;;  %v492_v2 = vsel %vm41_vm0, %v458_v61, -inf }
 0x556   :  { %v467_v5 = vpop.f32.mrb[5].mxu1  ;;  %493 = vmax.xlane.f32.xlu0 %v492_v2  ;;  %v473_v10 = vadd.f32 %v2379_v1, %v3203_v4 }
 0x557   :  { %v468_v7 = vadd.f32 %v467_v5, %v3199_v63 }
 0x558   :  { %v501_v23 = vsel %vm41_vm0, %v473_v10, -inf }
 0x559   :  { %v2382_v11 = vpop.f32.mrb[6].mxu1  ;;  %v498_v13 = vsel %vm41_vm0, %v468_v7, -inf }
 0x55a   :  { %v477_v19 = vpop.f32.mrb[7].mxu1  ;;  %499 = vmax.xlane.f32.xlu1 %v498_v13  ;;  %496 = vmax.xlane.f32.xlu0 %v495_v14  ;;  %v483_v21 = vadd.f32 %v2382_v11, %v3211_v17 }
 0x55b   :  { %v478_v20 = vadd.f32 %v477_v19, %v3206_v8 }
 0x55c   :  { %v507_v24 = vsel %vm41_vm0, %v483_v21, -inf }
 0x55d   :  { %v504_v22 = vsel %vm41_vm0, %v478_v20, -inf }
 0x55e   :  { %505 = vmax.xlane.f32.xlu1 %v504_v22  ;;  %502 = vmax.xlane.f32.xlu0 %v501_v23 }
 0x562   :  { %508 = vmax.xlane.f32.xlu0 %v507_v24 }
 0x56f   :  { %2854 = vrot.lane.b32.xlu1 %v3139_v3, %s3028_s26 }
 0x5de   :  { %v491_v25 = vpop.xlane.xlu1 %490 }
 0x5df   :  { %v511_v28 = vsub.f32 %v453_v16, %v491_v25  ;;  %v488_v29 = vpop.xlane.xlu0 %487 }
 0x5e0   :  { %v510_v30 = vsub.f32 %v448_v51, %v488_v29 }
 0x5e1   :  { %v520_v31 = vmul.f32 1.442695, %v511_v28 }
 0x5e2   :  { %v518_v32 = vmul.f32 1.442695, %v510_v30 }
 0x5e3   :  { %2917 = vpow2.f32 %v520_v31  ;;  %v494_v33 = vpop.xlane.xlu0 %493 }
 0x5e4   :  { %2919 = vpow2.f32 %v518_v32  ;;  %v512_v34 = vsub.f32 %v458_v61, %v494_v33 }
 0x5e6   :  { %v522_v35 = vmul.f32 1.442695, %v512_v34 }
 0x5e7   :  { %v500_v36 = vpop.xlane.xlu1 %499  ;;  %v497_v37 = vpop.xlane.xlu0 %496 }
 0x5e8   :  { %2921 = vpow2.f32 %v522_v35  ;;  %v514_v38 = vsub.f32 %v468_v7, %v500_v36  ;;  %v513_v39 = vsub.f32 %v463_v0, %v497_v37 }
 0x5ea   :  { %v526_v40 = vmul.f32 1.442695, %v514_v38  ;;  %v524_v41 = vmul.f32 1.442695, %v513_v39 }
 0x5eb   :  { %v506_v42 = vpop.xlane.xlu1 %505  ;;  %v503_v3 = vpop.xlane.xlu0 %502 }
 0x5ec   :  { %2923 = vpow2.f32 %v526_v40  ;;  %v515_v43 = vsub.f32 %v473_v10, %v503_v3  ;;  %v516_v49 = vsub.f32 %v478_v20, %v506_v42 }
 0x5ed   :  { %v3220_v45 = vpop.eup %2917  ;;  %2925 = vpow2.f32 %v524_v41 }
 0x5ee   :  { %v2920_v46 = vpop.eup %2919  ;;  %v528_v48 = vmul.f32 1.442695, %v515_v43  ;;  %v537_v15 = vsel %vm41_vm0, %v3220_v45, 0.0  ;;  %v530_v60 = vmul.f32 1.442695, %v516_v49 }
 0x5ef   :  { %v2855_v16 = vpop.permute.xlu1 %2854  ;;  %538 = vadd.xlane.f32.xlu0 %v537_v15  ;;  %v509_v50 = vpop.xlane.xlu0 %508  ;;  %v534_v51 = vsel %vm41_vm0, %v2920_v46, 0.0 }
 0x5f0   :  { %v2857_v52 = vunpack.i.h.bf16 %v2855_v16  ;;  %v2856_v53 = vunpack.i.l.bf16 %v2855_v16  ;;  %v517_v54 = vsub.f32 %v483_v21, %v509_v50  ;;  %535 = vadd.xlane.f32.xlu1 %v534_v51  ;;  %2927 = vpow2.f32 %v528_v48 }
 0x5f2   :  { %v3225_v56 = vpop.eup %2921  ;;  %v2651_v57 = vpack.c.bf16 %v2857_v52, %v2856_v53  ;;  %v532_v58 = vmul.f32 1.442695, %v517_v54  ;;  %v163_v53 = vld [vmem:[%s3697_s1 + $0x58] sm:$0xff]  ;;  %v164_v54 = vld [vmem:[%s3697_s1 + $0x60] sm:$0xff] }
 0x5f3   :  { %v540_v61 = vsel %vm41_vm0, %v3225_v56, 0.0 }
 0x5f4   :  { %2929 = vpow2.f32 %v532_v58  ;;  %2652 = vmatprep.subr.bf16.mxu0 %v2651_v57  ;;  %541 = vadd.xlane.f32.xlu1 %v540_v61  ;;  %v166_v58 = vld [vmem:[%s3697_s1 + $0x70] sm:$0xff] }
 0x5f5   :  { %2654 = vmatpush3.bf16.msra.mxu0 %v2651_v57  ;;  %2931 = vpow2.f32 %v530_v60  ;;  %v165_v57 = vld [vmem:[%s3697_s1 + $0x68] sm:$0xff] }
 0x5f6   :  { %v3229_v62 = vpop.eup %2923  ;;  %v2671_v60 = vpack.c.bf16 %v166_v58, %v165_v57  ;;  %v172_v57 = vld [vmem:[%s3697_s1 + $0xa0] sm:$0xff] }
 0x5f7   :  { %v3231_v0 = vpop.eup %2925  ;;  %v546_v1 = vsel %vm41_vm0, %v3229_v62, 0.0 }
 0x5f8   :  { %547 = vadd.xlane.f32.xlu1 %v546_v1  ;;  %v543_v2 = vsel %vm41_vm0, %v3231_v0, 0.0 }
 0x5f9   :  { %544 = vadd.xlane.f32.xlu0 %v543_v2 }
 0x5fa   :  { %v3237_v5 = vpop.eup %2927 }
 0x5fb   :  { %v549_v7 = vsel %vm41_vm0, %v3237_v5, 0.0 }
 0x5fd   :  { %550 = vadd.xlane.f32.xlu0 %v549_v7 }
 0x5fe   :  { %v3241_v10 = vpop.eup %2929 }
 0x5ff   :  { %v555_v11 = vsel %vm41_vm0, %v3241_v10, 0.0  ;;  %v2932_v13 = vpop.eup %2931 }
 0x600   :  { %v552_v14 = vsel %vm41_vm0, %v2932_v13, 0.0 }
 0x601   :  { %556 = vadd.xlane.f32.xlu0 %v555_v11 }
 0x605   :  { %553 = vadd.xlane.f32.xlu0 %v552_v14 }
 0x609   :  { %2864 = vrot.lane.b32.xlu1 %v3147_v9, %s3028_s26 }
 0x60d   :  { %2869 = vrot.lane.b32.xlu1 %v3151_v12, %s3028_s26 }
 0x61b   :  { %2859 = vrot.lane.b32.xlu0 %v3143_v6, %s3028_s26 }
 0x67c   :  { %v539_v20 = vpop.xlane.xlu0 %538 }
 0x67d   :  { %v536_v19 = vpop.xlane.xlu1 %535 }
 0x67e   :  { %2933 = vrcp.f32 %v536_v19 }
 0x67f   :  { %2935 = vrcp.f32 %v539_v20 }
 0x681   :  { %v542_v21 = vpop.xlane.xlu1 %541 }
 0x682   :  { %2937 = vrcp.f32 %v542_v21 }
 0x685   :  { %v548_v28 = vpop.xlane.xlu1 %547 }
 0x686   :  { %v545_v22 = vpop.xlane.xlu0 %544 }
 0x687   :  { %2939 = vrcp.f32 %v545_v22 }
 0x688   :  { %v2934_v23 = vpop.eup %2933  ;;  %2941 = vrcp.f32 %v548_v28 }
 0x689   :  { %v566_v24 = vmul.f32 %v2934_v23, %v2920_v46  ;;  %v2865_v30 = vpop.permute.xlu1 %2864  ;;  %v2936_v40 = vpop.eup %2935 }
 0x68a   :  { %v551_v25 = vpop.xlane.xlu0 %550  ;;  %v2867_v32 = vunpack.i.h.bf16 %v2865_v30  ;;  %v2866_v12 = vunpack.i.l.bf16 %v2865_v30  ;;  %v567_v42 = vmul.f32 %v2936_v40, %v3220_v45  ;;  %v2122_v30 = vld [vmem:[%s3697_s1 + $0x54] ss:$0 sm:$0xff] }
 0x68b   :  { %2399 = vmatprep.mubr.msk.f32.mxu0 %vm41_vm0, %v566_v24  ;;  %2943 = vrcp.f32 %v551_v25 }
 0x68c   :  { %v2659_v36 = vpack.c.bf16 %v2867_v32, %v2866_v12  ;;  %v2938_v41 = vpop.eup %2937 }
 0x68d   :  { %v2870_v6 = vpop.permute.xlu1 %2869  ;;  %v568_v43 = vmul.f32 %v2938_v41, %v3225_v56  ;;  %v2667_v56 = vpack.c.bf16 %v164_v54, %v163_v53  ;;  %v170_v53 = vld [vmem:[%s3697_s1 + $0x90] sm:$0xff] }
 0x68e   :  { %v557_v29 = vpop.xlane.xlu0 %556  ;;  %v2872_v37 = vunpack.i.h.bf16 %v2870_v6  ;;  %v2871_v38 = vunpack.i.l.bf16 %v2870_v6 }
 0x690   :  { %v2663_v39 = vpack.c.bf16 %v2872_v37, %v2871_v38 }
 0x691   :  { %v2940_v3 = vpop.eup %2939 }
 0x692   :  { %v554_v9 = vpop.xlane.xlu0 %553  ;;  %v2942_v46 = vpop.eup %2941  ;;  %v569_v48 = vmul.f32 %v2940_v3, %v3231_v0 }
 0x693   :  { %2945 = vrcp.f32 %v554_v9  ;;  %v570_v49 = vmul.f32 %v2942_v46, %v3229_v62  ;;  %v189_v46 = vld [vmem:[%s3698_s2 + $0x28] sm:$0xff] }
 0x694   :  { %2947 = vrcp.f32 %v557_v29 }
 0x695   :  { %v2944_v15 = vpop.eup %2943 }
 0x696   :  { %v2860_v31 = vpop.permute.xlu0 %2859  ;;  %v571_v45 = vmul.f32 %v2944_v15, %v3237_v5  ;;  %v190_v15 = vld [vmem:[%s3698_s2 + $0x30] sm:$0xff] }
 0x697   :  { %v2862_v33 = vunpack.i.h.bf16 %v2860_v31  ;;  %v2861_v34 = vunpack.i.l.bf16 %v2860_v31 }
 0x699   :  { %v2655_v35 = vpack.c.bf16 %v2862_v33, %v2861_v34 }
 0x69b   :  { %2656 = vmatprep.subr.bf16.mxu0 %v2655_v35 }
 0x69c   :  { %2658 = vmatpush3.bf16.msra.mxu0 %v2655_v35 }
 0x69d   :  { %2660 = vmatprep.subr.bf16.mxu0 %v2659_v36  ;;  %v2946_v16 = vpop.eup %2945 }
 0x69e   :  { %v2948_v50 = vpop.eup %2947  ;;  %v572_v51 = vmul.f32 %v2946_v16, %v2932_v13 }
 0x69f   :  { %v573_v52 = vmul.f32 %v2948_v50, %v3241_v10  ;;  %v168_v50 = vld [vmem:[%s3697_s1 + $0x80] sm:$0xff] }
 0x6a0   :  { %2662 = vmatpush3.bf16.msra.mxu0 %v2659_v36 }
 0x6a1   :  { %2664 = vmatprep.subr.bf16.mxu0 %v2663_v39 }
 0x6a4   :  { %2666 = vmatpush3.bf16.msra.mxu0 %v2663_v39 }
 0x6a5   :  { %2668 = vmatprep.subr.bf16.mxu0 %v2667_v56 }
 0x6a7   :  { %2400 = vmatmul.mubr.msk.f32.vlgmr.msra.gmra.mrb[4].mxu0 %vm41_vm0, %v567_v42 }
 0x6a8   :  { %2402 = vmatprep.mubr.msk.f32.mxu0 %vm41_vm0, %v568_v43  ;;  %2670 = vmatpush3.bf16.msra.mxu0 %v2667_v56  ;;  %v188_v43 = vld [vmem:[%s3698_s2 + $0x20] sm:$0xff]  ;;  %v171_v56 = vld [vmem:[%s3697_s1 + $0x98] sm:$0xff] }
 0x6a9   :  { %2672 = vmatprep.subr.bf16.mxu0 %v2671_v60  ;;  %v2691_v58 = vpack.c.bf16 %v172_v57, %v171_v56 }
 0x6ab   :  { %2403 = vmatmul.mubr.msk.f32.gmra.mrb[6].mxu0 %vm41_vm0, %v569_v48  ;;  %v2675_v48 = vpack.c.bf16 %v189_v46, %v188_v43  ;;  %v2130_v43 = vld [vmem:[%s3697_s1 + $0x55] ss:$0 sm:$0xff] }
 0x6ac   :  { %2405 = vmatprep.mubr.msk.f32.mxu0 %vm41_vm0, %v570_v49  ;;  %2674 = vmatpush3.bf16.msra.mxu0 %v2671_v60  ;;  %v191_v49 = vld [vmem:[%s3698_s2 + $0x38] sm:$0xff]  ;;  %v173_v60 = vld [vmem:[%s3697_s1 + $0xa8] sm:$0xff] }
 0x6ad   :  { %2676 = vmatprep.subr.bf16.mxu0 %v2675_v48  ;;  %v2679_v16 = vpack.c.bf16 %v191_v49, %v190_v15 }
 0x6af   :  { %2406 = vmatmul.mubr.msk.f32.gmra.mrb[8].mxu0 %vm41_vm0, %v571_v45  ;;  %v167_v45 = vld [vmem:[%s3697_s1 + $0x78] sm:$0xff] }
 0x6b0   :  { %2408 = vmatprep.mubr.msk.f32.mxu0 %vm41_vm0, %v572_v51  ;;  %v169_v51 = vld [vmem:[%s3697_s1 + $0x88] sm:$0xff] }
 0x6b1   :  { %v2687_v54 = vpack.c.bf16 %v170_v53, %v169_v51 }
 0x6b3   :  { %2409 = vmatmul.mubr.msk.f32.gmra.mrb[10].mxu0 %vm41_vm0, %v573_v52  ;;  %v2683_v52 = vpack.c.bf16 %v168_v50, %v167_v45 }
 0x6b5   :  { %2684 = vmatprep.subr.bf16.mxu1 %v2683_v52 }
 0x6b6   :  { %2686 = vmatpush3.bf16.msra.mxu1 %v2683_v52 }
 0x6b7   :  { %2688 = vmatprep.subr.bf16.mxu1 %v2687_v54 }
 0x6ba   :  { %2690 = vmatpush3.bf16.msra.mxu1 %v2687_v54 }
 0x6bb   :  { %2692 = vmatprep.subr.bf16.mxu1 %v2691_v58 }
 0x6be   :  { %2694 = vmatpush3.bf16.msra.mxu1 %v2691_v58 }
 0x77a   :  { %v2401_v61 = vpop.f32.mrb[4].mxu0 }
 0x77b   :  { %v688_v62 = vpop.f32.mrb[5].mxu0 }
 0x77e   :  { %v2404_v0 = vpop.f32.mrb[6].mxu0 }
 0x77f   :  { %731 = vrot.lane.b32.xlu1 %v2404_v0, %s3029_s7  ;;  %v698_v1 = vpop.f32.mrb[7].mxu0  ;;  %v175_v0 = vld [vmem:[%s3697_s1 + $0xb8] sm:$0xff] }
 0x782   :  { %v2407_v2 = vpop.f32.mrb[8].mxu0 }
 0x783   :  { %729 = vrot.lane.b32.xlu1 %v698_v1, %s3029_s7  ;;  %v708_v5 = vpop.f32.mrb[9].mxu0  ;;  %v176_v1 = vld [vmem:[%s3697_s1 + $0xc0] sm:$0xff] }
 0x784   :  { %737 = vrot.lane.b32.xlu0 %v708_v5, %s3030_s8  ;;  %v177_v5 = vld [vmem:[%s3697_s1 + $0xc8] sm:$0xff] }
 0x786   :  { %v2410_v7 = vpop.f32.mrb[10].mxu0 }
 0x787   :  { %739 = vrot.lane.b32.xlu1 %v2407_v2, %s3030_s8  ;;  %v718_v10 = vpop.f32.mrb[11].mxu0  ;;  %v2699_v2 = vpack.c.bf16 %v176_v1, %v175_v0  ;;  %v1081_v0 = vld [vmem:[%s3698_s2 + $0x50] sm:$0xff] }
 0x788   :  { %745 = vrot.lane.b32.xlu0 %v718_v10, %s3031_s9 }
 0x78b   :  { %747 = vrot.lane.b32.xlu1 %v2410_v7, %s3031_s9  ;;  %v178_v7 = vld [vmem:[%s3697_s1 + $0xd0] sm:$0xff] }
 0x78c   :  { %v2703_v10 = vpack.c.bf16 %v178_v7, %v177_v5  ;;  %v1083_v5 = vld [vmem:[%s3698_s2 + $0x60] sm:$0xff] }
 0x7f1   :  { %v732_v11 = vpop.permute.xlu1 %731 }
 0x7f2   :  { %v752_v24 = vsel %vm348_vm4, %v2401_v61, %v732_v11  ;;  %v174_v61 = vld [vmem:[%s3697_s1 + $0xb0] sm:$0xff]  ;;  %v179_v11 = vld [vmem:[%s3697_s1 + $0xd8] sm:$0xff] }
 0x7f5   :  { %v730_v13 = vpop.permute.xlu1 %729 }
 0x7f6   :  { %v738_v14 = vpop.permute.xlu0 %737  ;;  %v751_v19 = vsel %vm348_vm4, %v688_v62, %v730_v13  ;;  %v2695_v62 = vpack.c.bf16 %v174_v61, %v173_v60  ;;  %v180_v13 = vld [vmem:[%s3697_s1 + $0xe0] sm:$0xff] }
 0x7f7   :  { %v754_v21 = vsel %vm753_vm14, %v751_v19, %v738_v14  ;;  %v2707_v14 = vpack.c.bf16 %v180_v13, %v179_v11 }
 0x7f8   :  { %2696 = vmatprep.subr.bf16.mxu1 %v2695_v62 }
 0x7f9   :  { %v740_v20 = vpop.permute.xlu1 %739  ;;  %2698 = vmatpush3.bf16.msra.mxu1 %v2695_v62  ;;  %v1080_v62 = vld [vmem:[%s3698_s2 + $0x48] sm:$0xff] }
 0x7fa   :  { %v746_v22 = vpop.permute.xlu0 %745  ;;  %v755_v25 = vsel %vm753_vm14, %v752_v24, %v740_v20  ;;  %2700 = vmatprep.subr.bf16.mxu1 %v2699_v2  ;;  %v2715_v1 = vpack.c.bf16 %v1081_v0, %v1080_v62 }
 0x7fb   :  { %v757_v23 = vsel %vm756_vm15, %v754_v21, %v746_v22 }
 0x7fc   :  { %2419 = vmatprep.mubr.msk.f32.mxu0 %vm193_vm3, %v757_v23 }
 0x7fd   :  { %v748_v28 = vpop.permute.xlu1 %747  ;;  %2702 = vmatpush3.bf16.msra.mxu1 %v2699_v2  ;;  %v1082_v2 = vld [vmem:[%s3698_s2 + $0x58] sm:$0xff] }
 0x7fe   :  { %v758_v29 = vsel %vm756_vm15, %v755_v25, %v748_v28  ;;  %2704 = vmatprep.subr.bf16.mxu1 %v2703_v10  ;;  %v2125_v28 = vld [vmem:[%s3697_s1 + $0x52] ss:$0 sm:$0xff]  ;;  %v2719_v7 = vpack.c.bf16 %v1083_v5, %v1082_v2 }
 0x7ff   :  { %2420 = vmatmul.mubr.msk.f32.vlgmr.msra.gmra.mrb[12].mxu0 %vm193_vm3, %v758_v29 }
 0x800   :  { %2678 = vmatpush3.bf16.msra.mxu0 %v2675_v48 }
 0x801   :  { %2680 = vmatprep.subr.bf16.mxu0 %v2679_v16  ;;  %2706 = vmatpush3.bf16.msra.mxu1 %v2703_v10 }
 0x802   :  { %2708 = vmatprep.subr.bf16.mxu1 %v2707_v14 }
 0x804   :  { %2682 = vmatpush3.bf16.msra.mxu0 %v2679_v16 }
 0x805   :  { %2710 = vmatpush3.bf16.msra.mxu1 %v2707_v14  ;;  %2716 = vmatprep.subr.bf16.mxu0 %v2715_v1 }
 0x8d2   :  { %v2421_v9 = vpop.f32.mrb[12].mxu0 }
 0x8d3   :  { %v841_v31 = vadd.f32 %v2421_v9, %v2122_v30  ;;  %v835_v32 = vpop.f32.mrb[13].mxu0 }
 0x8d4   :  { %v836_v12 = vadd.f32 %v2122_v30, %v835_v32  ;;  %v2126_v30 = vld [vmem:[%s3697_s1 + $0x53] ss:$0 sm:$0xff] }
 0x8d5   :  { %v3296_v33 = vadd.f32 %v841_v31, %v3099_v27 }
 0x8d6   :  { %v3299_v34 = vadd.f32 %v836_v12, %v3097_v26 }
 0x8d7   :  { %v849_v6 = vsel %vm193_vm3, %v3296_v33, 0.0 }
 0x8d8   :  { %850 = vadd.xlane.f32.xlu1 %v849_v6  ;;  %v846_v35 = vsel %vm193_vm3, %v3299_v34, 0.0 }
 0x8d9   :  { %847 = vadd.xlane.f32.xlu0 %v846_v35 }
 0x965   :  { %v851_v36 = vpop.xlane.xlu1 %850 }
 0x966   :  { %v853_v37 = vmul.f32 0.03125, %v851_v36  ;;  %v848_v38 = vpop.xlane.xlu0 %847  ;;  %v181_v36 = vld [vmem:[%s3697_s1 + $0xe8] sm:$0xff] }
 0x967   :  { %v852_v39 = vmul.f32 0.03125, %v848_v38 }
 0x968   :  { %v3306_v40 = vsub.f32 %v3296_v33, %v853_v37  ;;  %v182_v37 = vld [vmem:[%s3697_s1 + $0xf0] sm:$0xff] }
 0x969   :  { %v854_v27 = vsub.f32 %v3299_v34, %v852_v39  ;;  %v2711_v38 = vpack.c.bf16 %v182_v37, %v181_v36  ;;  %v2127_v39 = vld [vmem:[%s3698_s2 + $0x41] ss:$0 sm:$0xff] }
 0x96a   :  { %v857_v42 = vmul.f32 %v3306_v40, %v3306_v40 }
 0x96b   :  { %v856_v41 = vmul.f32 %v854_v27, %v854_v27  ;;  %2712 = vmatprep.subr.bf16.mxu1 %v2711_v38 }
 0x96c   :  { %v861_v3 = vsel %vm193_vm3, %v857_v42, 0.0  ;;  %2714 = vmatpush3.bf16.msra.mxu1 %v2711_v38 }
 0x96d   :  { %v858_v26 = vsel %vm193_vm3, %v856_v41, 0.0 }
 0x96e   :  { %859 = vadd.xlane.f32.xlu0 %v858_v26 }
 0x972   :  { %862 = vadd.xlane.f32.xlu0 %v861_v3 }
 0x9fb   :  { %v860_v19 = vpop.xlane.xlu0 %859 }
 0x9fc   :  { %v864_v20 = vmul.f32 0.03125, %v860_v19 }
 0x9fe   :  { %v866_v21 = vadd.f32 1e-05, %v864_v20 }
 0x9ff   :  { %v863_v22 = vpop.xlane.xlu0 %862 }
 0xa00   :  { %2949 = vrsqrt.f32 %v866_v21  ;;  %v865_v23 = vmul.f32 0.03125, %v863_v22  ;;  %v2131_v22 = vld [vmem:[%s3697_s1 + $0xf8] ss:$0 sm:$0xff] }
 0xa02   :  { %v867_v24 = vadd.f32 1e-05, %v865_v23 }
 0xa04   :  { %2951 = vrsqrt.f32 %v867_v24 }
 0xa0a   :  { %v2950_v25 = vpop.eup %2949 }
 0xa0b   :  { %v870_v29 = vmul.f32 %v2950_v25, %v854_v27 }
 0xa0d   :  { %v876_v9 = vmul.f32 %v2125_v28, %v870_v29 }
 0xa0e   :  { %v2952_v31 = vpop.eup %2951 }
 0xa0f   :  { %v871_v32 = vmul.f32 %v2952_v31, %v3306_v40  ;;  %v882_v12 = vadd.f32 %v2126_v30, %v876_v9 }
 0xa11   :  { %v877_v6 = vmul.f32 %v2125_v28, %v871_v32  ;;  %2430 = vmatprep.mubr.msk.f32.mxu0 %vm193_vm3, %v882_v12  ;;  %v2132_v28 = vld [vmem:[%s3697_s1 + $0xf9] ss:$0 sm:$0xff]  ;;  %v2133_v32 = vld [vmem:[%s3698_s2 + $0x88] ss:$0 sm:$0xff] }
 0xa13   :  { %v883_v35 = vadd.f32 %v2126_v30, %v877_v6 }
 0xa15   :  { %2431 = vmatmul.mubr.msk.f32.vlgmr.msra.gmra.mrb[14].mxu0 %vm193_vm3, %v883_v35 }
 0xa16   :  { %2718 = vmatpush3.bf16.msra.mxu0 %v2715_v1 }
 0xa17   :  { %2720 = vmatprep.subr.bf16.mxu0 %v2719_v7 }
 0xa1a   :  { %2722 = vmatpush3.bf16.msra.mxu0 %v2719_v7 }
 0xae8   :  { %v2432_v40 = vpop.f32.mrb[14].mxu0 }
 0xae9   :  { %v966_v27 = vadd.f32 %v2432_v40, %v2127_v39  ;;  %v960_v41 = vpop.f32.mrb[15].mxu0 }
 0xaea   :  { %v961_v26 = vadd.f32 %v2127_v39, %v960_v41 }
 0xaeb   :  { %v970_v3 = vmax.f32 %v966_v27, 0.0 }
 0xaec   :  { %v969_v42 = vmax.f32 %v961_v26, 0.0 }
 0xaee   :  { %2465 = vmatprep.mubr.f32.mxu1 %v969_v42 }
 0xaef   :  { %2466 = vmatmul.mubr.f32.vlgmr.msra.gmra.mrb[8].mxu1 %v970_v3 }
 0xbc2   :  { %v2467_v46 = vpop.f32.mrb[8].mxu1 }
 0xbc3   :  { %v1047_v48 = vadd.f32 %v2467_v46, %v3296_v33  ;;  %v1037_v15 = vpop.f32.mrb[9].mxu1 }
 0xbc4   :  { %v1046_v49 = vadd.f32 %v1037_v15, %v3299_v34 }
 0xbc5   :  { %v3390_v16 = vadd.f32 %v2130_v43, %v1047_v48 }
 0xbc6   :  { %v3392_v45 = vadd.f32 %v2130_v43, %v1046_v49 }
 0xbc7   :  { %v1093_v50 = vsel %vm193_vm3, %v3390_v16, 0.0 }
 0xbc8   :  { %1094 = vadd.xlane.f32.xlu0 %v1093_v50  ;;  %v1090_v51 = vsel %vm193_vm3, %v3392_v45, 0.0 }
 0xbc9   :  { %1091 = vadd.xlane.f32.xlu1 %v1090_v51 }
 0xc55   :  { %v1095_v52 = vpop.xlane.xlu0 %1094 }
 0xc56   :  { %v1097_v53 = vmul.f32 0.03125, %v1095_v52  ;;  %v1092_v54 = vpop.xlane.xlu1 %1091 }
 0xc57   :  { %v1096_v56 = vmul.f32 0.03125, %v1092_v54 }
 0xc58   :  { %v1099_v33 = vsub.f32 %v3390_v16, %v1097_v53 }
 0xc59   :  { %v1098_v34 = vsub.f32 %v3392_v45, %v1096_v56 }
 0xc5a   :  { %v1101_v57 = vmul.f32 %v1099_v33, %v1099_v33 }
 0xc5b   :  { %v1100_v58 = vmul.f32 %v1098_v34, %v1098_v34 }
 0xc5c   :  { %v1105_v60 = vsel %vm193_vm3, %v1101_v57, 0.0 }
 0xc5d   :  { %1106 = vadd.xlane.f32.xlu0 %v1105_v60  ;;  %v1102_v61 = vsel %vm193_vm3, %v1100_v58, 0.0 }
 0xc5e   :  { %1103 = vadd.xlane.f32.xlu1 %v1102_v61 }
 0xcea   :  { %v1107_v10 = vpop.xlane.xlu0 %1106 }
 0xceb   :  { %v1109_v11 = vmul.f32 0.03125, %v1107_v10  ;;  %v1104_v13 = vpop.xlane.xlu1 %1103 }
 0xcec   :  { %v1108_v14 = vmul.f32 0.03125, %v1104_v13 }
 0xced   :  { %v1111_v19 = vadd.f32 1e-05, %v1109_v11 }
 0xcee   :  { %v1110_v20 = vadd.f32 1e-05, %v1108_v14 }
 0xcef   :  { %2953 = vrsqrt.f32 %v1111_v19 }
 0xcf0   :  { %2955 = vrsqrt.f32 %v1110_v20 }
 0xcf9   :  { %v2954_v21 = vpop.eup %2953 }
 0xcfa   :  { %v2956_v23 = vpop.eup %2955  ;;  %v1115_v24 = vmul.f32 %v2954_v21, %v1099_v33 }
 0xcfb   :  { %v1114_v25 = vmul.f32 %v2956_v23, %v1098_v34 }
 0xcfc   :  { %v1121_v29 = vmul.f32 %v2131_v22, %v1115_v24 }
 0xcfd   :  { %v1120_v30 = vmul.f32 %v2131_v22, %v1114_v25 }
 0xcfe   :  { %v1127_v31 = vadd.f32 %v2132_v28, %v1121_v29 }
 0xcff   :  { %v1126_v9 = vadd.f32 %v2132_v28, %v1120_v30 }
 0xd01   :  { %2476 = vmatprep.mubr.msk.f32.mxu0 %vm193_vm3, %v1126_v9 }
 0xd02   :  { %2477 = vmatmul.mubr.msk.f32.vlgmr.msra.gmra.mrb[16].mxu0 %vm193_vm3, %v1127_v31 }
 0xdd5   :  { %v2478_v12 = vpop.f32.mrb[16].mxu0 }
 0xdd6   :  { %v1210_v6 = vadd.f32 %v2478_v12, %v2133_v32  ;;  %v1204_v35 = vpop.f32.mrb[17].mxu0 }
 0xdd7   :  { %v1205_v36 = vadd.f32 %v2133_v32, %v1204_v35 }
 0xdd8   :  { %1217 = vrot.lane.b32.xlu0 %v1210_v6, %s3023_s22 }
 0xdd9   :  { %1215 = vrot.lane.b32.xlu1 %v1205_v36, %s3023_s22  ;;  %2495 = vmatprep.mubr.msk.f32.mxu0 %vm348_vm4, %v1205_v36  ;;  %v3430_v37 = vpack.i.bf16 %v1210_v6, %v1205_v36 }
 0xddc   :  { %1223 = vrot.lane.b32.xlu0 %v1205_v36, %s3024_s23 }
 0xddd   :  { %1219 = vrot.lane.b32.xlu1 %v1205_v36, %s3025_s24 }
 0xde0   :  { %2874 = vrot.lane.b32.xlu0 %v3430_v37, %s3026_s25 }
 0xde1   :  { %1221 = vrot.lane.b32.xlu1 %v1210_v6, %s3025_s24 }
 0xde5   :  { %1225 = vrot.lane.b32.xlu1 %v1210_v6, %s3024_s23 }
 0xe4a   :  { %v1218_v38 = vpop.permute.xlu0 %1217 }
 0xe4b   :  { %v1216_v39 = vpop.permute.xlu1 %1215 }
 0xe4c   :  { %v3436_v40 = vpack.i.bf16 %v1218_v38, %v1216_v39 }
 0xe4e   :  { %v1224_v27 = vpop.permute.xlu0 %1223  ;;  %2879 = vrot.lane.b32.xlu1 %v3436_v40, %s3026_s25 }
 0xe4f   :  { %v1220_v41 = vpop.permute.xlu1 %1219 }
 0xe52   :  { %v2875_v26 = vpop.permute.xlu0 %2874 }
 0xe53   :  { %v2877_v42 = vunpack.i.h.bf16 %v2875_v26  ;;  %v2876_v3 = vunpack.i.l.bf16 %v2875_v26  ;;  %v1222_v43 = vpop.permute.xlu1 %1221 }
 0xe54   :  { %v3440_v46 = vpack.i.bf16 %v1222_v43, %v1220_v41 }
 0xe55   :  { %v2723_v48 = vpack.c.bf16 %v2877_v42, %v2876_v3 }
 0xe56   :  { %2884 = vrot.lane.b32.xlu0 %v3440_v46, %s3026_s25 }
 0xe57   :  { %2725 = vmatprep.subr.msk.bf16.mxu0 %vm3157_vm5, %v2723_v48  ;;  %v1226_v15 = vpop.permute.xlu1 %1225 }
 0xe58   :  { %v3446_v49 = vpack.i.bf16 %v1226_v15, %v1224_v27  ;;  %2728 = vmatpush3.bf16.xpose.msk.msra.mxu0 %vm3157_vm5, %v2723_v48 }
 0xe5a   :  { %2889 = vrot.lane.b32.xlu1 %v3446_v49, %s3026_s25 }
 0xec0   :  { %v2880_v50 = vpop.permute.xlu1 %2879 }
 0xec1   :  { %v2882_v51 = vunpack.i.h.bf16 %v2880_v50  ;;  %v2881_v52 = vunpack.i.l.bf16 %v2880_v50 }
 0xec3   :  { %v2729_v53 = vpack.c.bf16 %v2882_v51, %v2881_v52 }
 0xec5   :  { %2731 = vmatprep.subr.msk.bf16.mxu0 %vm3157_vm5, %v2729_v53 }
 0xec6   :  { %2734 = vmatpush3.bf16.xpose.msk.msra.mxu0 %vm3157_vm5, %v2729_v53 }
 0xec8   :  { %v2885_v54 = vpop.permute.xlu0 %2884 }
 0xec9   :  { %v2887_v56 = vunpack.i.h.bf16 %v2885_v54  ;;  %v2886_v33 = vunpack.i.l.bf16 %v2885_v54 }
 0xecb   :  { %v2735_v34 = vpack.c.bf16 %v2887_v56, %v2886_v33 }
 0xecc   :  { %v2890_v57 = vpop.permute.xlu1 %2889 }
 0xecd   :  { %v2892_v58 = vunpack.i.h.bf16 %v2890_v57  ;;  %v2891_v60 = vunpack.i.l.bf16 %v2890_v57  ;;  %2737 = vmatprep.subr.msk.bf16.mxu0 %vm3157_vm5, %v2735_v34 }
 0xece   :  { %2740 = vmatpush3.bf16.xpose.msk.msra.mxu0 %vm3157_vm5, %v2735_v34 }
 0xecf   :  { %v2741_v61 = vpack.c.bf16 %v2892_v58, %v2891_v60 }
 0xed1   :  { %2743 = vmatprep.subr.msk.bf16.mxu0 %vm3157_vm5, %v2741_v61 }
 0xed6   :  { %2746 = vmatpush3.bf16.xpose.msk.msra.mxu0 %vm3157_vm5, %v2741_v61 }
 0xedd   :  { %2496 = vmatmul.mubr.msk.f32.vlgmr.msra.gmra.mrb[18].mxu0 %vm348_vm4, %v1210_v6 }
 0xede   :  { %2498 = vmatprep.mubr.msk.f32.mxu0 %vm348_vm4, %v1216_v39 }
 0xee1   :  { %2499 = vmatmul.mubr.msk.f32.gmra.mrb[20].mxu0 %vm348_vm4, %v1218_v38 }
 0xee2   :  { %2501 = vmatprep.mubr.msk.f32.mxu0 %vm348_vm4, %v1220_v41 }
 0xee5   :  { %2502 = vmatmul.mubr.msk.f32.gmra.mrb[22].mxu0 %vm348_vm4, %v1222_v43 }
 0xee6   :  { %2504 = vmatprep.mubr.msk.f32.mxu0 %vm348_vm4, %v1224_v27 }
 0xee9   :  { %2505 = vmatmul.mubr.msk.f32.gmra.mrb[24].mxu0 %vm348_vm4, %v1226_v15 }
 0xfb0   :  { %v2497_v62 = vpop.f32.mrb[18].mxu0 }
 0xfb1   :  { %v1347_v0 = vadd.f32 %v2497_v62, %v3186_v44  ;;  %v1341_v1 = vpop.f32.mrb[19].mxu0 }
 0xfb2   :  { %v1342_v18 = vadd.f32 %v1341_v1, %v3188_v47 }
 0xfb3   :  { %v1383_v2 = vsel %vm41_vm0, %v1347_v0, -inf }
 0xfb4   :  { %1384 = vmax.xlane.f32.xlu1 %v1383_v2  ;;  %v2500_v5 = vpop.f32.mrb[20].mxu0  ;;  %v1380_v7 = vsel %vm41_vm0, %v1342_v18, -inf }
 0xfb5   :  { %v1351_v10 = vpop.f32.mrb[21].mxu0  ;;  %1381 = vmax.xlane.f32.xlu0 %v1380_v7  ;;  %v1357_v13 = vadd.f32 %v2500_v5, %v3196_v59 }
 0xfb6   :  { %v1352_v11 = vadd.f32 %v1351_v10, %v3193_v55 }
 0xfb7   :  { %v1389_v23 = vsel %vm41_vm0, %v1357_v13, -inf }
 0xfb8   :  { %v2503_v14 = vpop.f32.mrb[22].mxu0  ;;  %v1386_v19 = vsel %vm41_vm0, %v1352_v11, -inf }
 0xfb9   :  { %v1361_v20 = vpop.f32.mrb[23].mxu0  ;;  %1387 = vmax.xlane.f32.xlu0 %v1386_v19  ;;  %v1367_v47 = vadd.f32 %v2503_v14, %v3203_v4 }
 0xfba   :  { %v1362_v44 = vadd.f32 %v1361_v20, %v3199_v63 }
 0xfbb   :  { %v1395_v28 = vsel %vm41_vm0, %v1367_v47, -inf }
 0xfbc   :  { %v2506_v21 = vpop.f32.mrb[24].mxu0  ;;  %v1392_v22 = vsel %vm41_vm0, %v1362_v44, -inf }
 0xfbd   :  { %v1371_v24 = vpop.f32.mrb[25].mxu0  ;;  %1393 = vmax.xlane.f32.xlu1 %v1392_v22  ;;  %1390 = vmax.xlane.f32.xlu0 %v1389_v23  ;;  %v1377_v59 = vadd.f32 %v2506_v21, %v3211_v17 }
 0xfbe   :  { %v1372_v55 = vadd.f32 %v1371_v24, %v3206_v8 }
 0xfbf   :  { %v1401_v63 = vsel %vm41_vm0, %v1377_v59, -inf }
 0xfc0   :  { %v1398_v25 = vsel %vm41_vm0, %v1372_v55, -inf }
 0xfc1   :  { %1399 = vmax.xlane.f32.xlu1 %v1398_v25  ;;  %1396 = vmax.xlane.f32.xlu0 %v1395_v28 }
 0xfc5   :  { %1402 = vmax.xlane.f32.xlu0 %v1401_v63 }
 0xfd2   :  { %2894 = vrot.lane.b32.xlu1 %v3430_v37, %s3028_s26 }
0x1041   :  { %v1385_v4 = vpop.xlane.xlu1 %1384 }
0x1042   :  { %v1405_v29 = vsub.f32 %v1347_v0, %v1385_v4  ;;  %v1382_v30 = vpop.xlane.xlu0 %1381 }
0x1043   :  { %v1404_v9 = vsub.f32 %v1342_v18, %v1382_v30 }
0x1044   :  { %v1414_v31 = vmul.f32 1.442695, %v1405_v29 }
0x1045   :  { %v1412_v8 = vmul.f32 1.442695, %v1404_v9 }
0x1046   :  { %2957 = vpow2.f32 %v1414_v31  ;;  %v1388_v17 = vpop.xlane.xlu0 %1387 }
0x1047   :  { %2959 = vpow2.f32 %v1412_v8  ;;  %v1406_v32 = vsub.f32 %v1352_v11, %v1388_v17 }
0x1049   :  { %v1416_v12 = vmul.f32 1.442695, %v1406_v32 }
0x104a   :  { %v1394_v6 = vpop.xlane.xlu1 %1393  ;;  %v1391_v35 = vpop.xlane.xlu0 %1390 }
0x104b   :  { %2961 = vpow2.f32 %v1416_v12  ;;  %v1408_v36 = vsub.f32 %v1362_v44, %v1394_v6  ;;  %v1407_v38 = vsub.f32 %v1357_v13, %v1391_v35 }
0x104d   :  { %v1420_v39 = vmul.f32 1.442695, %v1408_v36  ;;  %v1418_v27 = vmul.f32 1.442695, %v1407_v38 }
0x104e   :  { %v1400_v41 = vpop.xlane.xlu1 %1399  ;;  %v1397_v37 = vpop.xlane.xlu0 %1396 }
0x104f   :  { %2963 = vpow2.f32 %v1420_v39  ;;  %v1409_v26 = vsub.f32 %v1367_v47, %v1397_v37  ;;  %v1410_v15 = vsub.f32 %v1372_v55, %v1400_v41 }
0x1050   :  { %v3489_v42 = vpop.eup %2957  ;;  %2965 = vpow2.f32 %v1418_v27 }
0x1051   :  { %v2960_v3 = vpop.eup %2959  ;;  %v1422_v43 = vmul.f32 1.442695, %v1409_v26  ;;  %v1431_v48 = vsel %vm41_vm0, %v3489_v42, 0.0  ;;  %v1424_v58 = vmul.f32 1.442695, %v1410_v15  ;;  %v1063_v15 = vld [vmem:[%s3697_s1 + $0x118] sm:$0xff] }
0x1052   :  { %v2895_v50 = vpop.permute.xlu1 %2894  ;;  %1432 = vadd.xlane.f32.xlu0 %v1431_v48  ;;  %v1403_v51 = vpop.xlane.xlu0 %1402  ;;  %v1428_v52 = vsel %vm41_vm0, %v2960_v3, 0.0  ;;  %v1062_v48 = vld [vmem:[%s3697_s1 + $0x110] sm:$0xff] }
0x1053   :  { %v2897_v53 = vunpack.i.h.bf16 %v2895_v50  ;;  %v2896_v54 = vunpack.i.l.bf16 %v2895_v50  ;;  %v1411_v56 = vsub.f32 %v1377_v59, %v1403_v51  ;;  %1429 = vadd.xlane.f32.xlu1 %v1428_v52  ;;  %2967 = vpow2.f32 %v1422_v43 }
0x1054   :  { %v2767_v50 = vpack.c.bf16 %v1063_v15, %v1062_v48  ;;  %v1075_v48 = vld [vmem:[%s3697_s1 + $0x178] sm:$0xff] }
0x1055   :  { %v3494_v33 = vpop.eup %2961  ;;  %v2747_v34 = vpack.c.bf16 %v2897_v53, %v2896_v54  ;;  %v1426_v57 = vmul.f32 1.442695, %v1411_v56 }
0x1056   :  { %v1434_v60 = vsel %vm41_vm0, %v3494_v33, 0.0 }
0x1057   :  { %2969 = vpow2.f32 %v1426_v57  ;;  %2748 = vmatprep.subr.bf16.mxu1 %v2747_v34  ;;  %1435 = vadd.xlane.f32.xlu1 %v1434_v60 }
0x1058   :  { %2750 = vmatpush3.bf16.msra.mxu1 %v2747_v34  ;;  %2971 = vpow2.f32 %v1424_v58 }
0x1059   :  { %v3498_v61 = vpop.eup %2963 }
0x105a   :  { %v3500_v62 = vpop.eup %2965  ;;  %v1440_v0 = vsel %vm41_vm0, %v3498_v61, 0.0 }
0x105b   :  { %1441 = vadd.xlane.f32.xlu1 %v1440_v0  ;;  %v1437_v1 = vsel %vm41_vm0, %v3500_v62, 0.0 }
0x105c   :  { %1438 = vadd.xlane.f32.xlu0 %v1437_v1 }
0x105d   :  { %v3506_v18 = vpop.eup %2967 }
0x105e   :  { %v1443_v2 = vsel %vm41_vm0, %v3506_v18, 0.0 }
0x1060   :  { %1444 = vadd.xlane.f32.xlu0 %v1443_v2 }
0x1061   :  { %v3510_v5 = vpop.eup %2969 }
0x1062   :  { %v1449_v7 = vsel %vm41_vm0, %v3510_v5, 0.0  ;;  %v2972_v10 = vpop.eup %2971 }
0x1063   :  { %v1446_v11 = vsel %vm41_vm0, %v2972_v10, 0.0 }
0x1064   :  { %1450 = vadd.xlane.f32.xlu0 %v1449_v7 }
0x1068   :  { %1447 = vadd.xlane.f32.xlu0 %v1446_v11 }
0x106c   :  { %2904 = vrot.lane.b32.xlu1 %v3440_v46, %s3028_s26 }
0x1070   :  { %2909 = vrot.lane.b32.xlu1 %v3446_v49, %s3028_s26 }
0x107e   :  { %2899 = vrot.lane.b32.xlu0 %v3436_v40, %s3028_s26 }
0x10df   :  { %v1433_v14 = vpop.xlane.xlu0 %1432 }
0x10e0   :  { %v1430_v13 = vpop.xlane.xlu1 %1429 }
0x10e1   :  { %2973 = vrcp.f32 %v1430_v13  ;;  %v2160_v13 = vld [vmem:[%s3697_s1 + $0xfc] ss:$0 sm:$0xff] }
0x10e2   :  { %2975 = vrcp.f32 %v1433_v14 }
0x10e4   :  { %v1436_v19 = vpop.xlane.xlu1 %1435 }
0x10e5   :  { %2977 = vrcp.f32 %v1436_v19 }
0x10e8   :  { %v1442_v22 = vpop.xlane.xlu1 %1441 }
0x10e9   :  { %v1439_v20 = vpop.xlane.xlu0 %1438 }
0x10ea   :  { %2979 = vrcp.f32 %v1439_v20 }
0x10eb   :  { %v2974_v44 = vpop.eup %2973  ;;  %2981 = vrcp.f32 %v1442_v22 }
0x10ec   :  { %v1460_v47 = vmul.f32 %v2974_v44, %v2960_v3  ;;  %v2905_v24 = vpop.permute.xlu1 %2904  ;;  %v2976_v31 = vpop.eup %2975  ;;  %v1061_v3 = vld [vmem:[%s3697_s1 + $0x108] sm:$0xff] }
0x10ed   :  { %v1445_v21 = vpop.xlane.xlu0 %1444  ;;  %v2907_v59 = vunpack.i.h.bf16 %v2905_v24  ;;  %v2906_v49 = vunpack.i.l.bf16 %v2905_v24  ;;  %v1461_v17 = vmul.f32 %v2976_v31, %v3489_v42  ;;  %v1060_v42 = vld [vmem:[%s3697_s1 + $0x100] sm:$0xff] }
0x10ee   :  { %2523 = vmatprep.mubr.msk.f32.mxu1 %vm41_vm0, %v1460_v47  ;;  %2983 = vrcp.f32 %v1445_v21  ;;  %v2763_v43 = vpack.c.bf16 %v1061_v3, %v1060_v42  ;;  %v1073_v42 = vld [vmem:[%s3697_s1 + $0x168] sm:$0xff] }
0x10ef   :  { %v2755_v4 = vpack.c.bf16 %v2907_v59, %v2906_v49  ;;  %v2978_v8 = vpop.eup %2977 }
0x10f0   :  { %v2910_v40 = vpop.permute.xlu1 %2909  ;;  %v1462_v12 = vmul.f32 %v2978_v8, %v3494_v33  ;;  %v1064_v8 = vld [vmem:[%s3697_s1 + $0x120] sm:$0xff] }
0x10f1   :  { %v1451_v23 = vpop.xlane.xlu0 %1450  ;;  %v2912_v29 = vunpack.i.h.bf16 %v2910_v40  ;;  %v2911_v30 = vunpack.i.l.bf16 %v2910_v40 }
0x10f3   :  { %v2759_v9 = vpack.c.bf16 %v2912_v29, %v2911_v30  ;;  %v1087_v30 = vld [vmem:[%s3698_s2 + $0x78] sm:$0xff] }
0x10f4   :  { %v2980_v32 = vpop.eup %2979 }
0x10f5   :  { %v1448_v46 = vpop.xlane.xlu0 %1447  ;;  %v2982_v6 = vpop.eup %2981  ;;  %v1463_v35 = vmul.f32 %v2980_v32, %v3500_v62  ;;  %v1066_v32 = vld [vmem:[%s3697_s1 + $0x130] sm:$0xff] }
0x10f6   :  { %2985 = vrcp.f32 %v1448_v46  ;;  %v1464_v38 = vmul.f32 %v2982_v6, %v3498_v61  ;;  %v1067_v6 = vld [vmem:[%s3697_s1 + $0x138] sm:$0xff] }
0x10f7   :  { %2987 = vrcp.f32 %v1451_v23 }
0x10f8   :  { %v2984_v36 = vpop.eup %2983 }
0x10f9   :  { %v2900_v55 = vpop.permute.xlu0 %2899  ;;  %v1465_v27 = vmul.f32 %v2984_v36, %v3506_v18  ;;  %v1068_v36 = vld [vmem:[%s3697_s1 + $0x140] sm:$0xff] }
0x10fa   :  { %v2902_v25 = vunpack.i.h.bf16 %v2900_v55  ;;  %v2901_v28 = vunpack.i.l.bf16 %v2900_v55 }
0x10fc   :  { %v2751_v63 = vpack.c.bf16 %v2902_v25, %v2901_v28 }
0x10fe   :  { %2752 = vmatprep.subr.bf16.mxu1 %v2751_v63 }
0x10ff   :  { %2754 = vmatpush3.bf16.msra.mxu1 %v2751_v63  ;;  %v1085_v63 = vld [vmem:[%s3698_s2 + $0x68] sm:$0xff] }
0x1100   :  { %2756 = vmatprep.subr.bf16.mxu1 %v2755_v4  ;;  %v2986_v39 = vpop.eup %2985 }
0x1101   :  { %v2988_v41 = vpop.eup %2987  ;;  %v1466_v37 = vmul.f32 %v2986_v39, %v2972_v10 }
0x1102   :  { %v1467_v26 = vmul.f32 %v2988_v41, %v3510_v5  ;;  %v1071_v41 = vld [vmem:[%s3697_s1 + $0x158] sm:$0xff] }
0x1103   :  { %2758 = vmatpush3.bf16.msra.mxu1 %v2755_v4  ;;  %v1086_v4 = vld [vmem:[%s3698_s2 + $0x70] sm:$0xff] }
0x1104   :  { %2760 = vmatprep.subr.bf16.mxu1 %v2759_v9  ;;  %v2771_v29 = vpack.c.bf16 %v1086_v4, %v1085_v63 }
0x1106   :  { %2772 = vmatprep.subr.bf16.mxu0 %v2771_v29 }
0x1107   :  { %2762 = vmatpush3.bf16.msra.mxu1 %v2759_v9  ;;  %2774 = vmatpush3.bf16.msra.mxu0 %v2771_v29  ;;  %v1088_v9 = vld [vmem:[%s3698_s2 + $0x80] sm:$0xff] }
0x1108   :  { %2764 = vmatprep.subr.bf16.mxu1 %v2763_v43  ;;  %v2775_v31 = vpack.c.bf16 %v1088_v9, %v1087_v30 }
0x110a   :  { %2524 = vmatmul.mubr.msk.f32.vlgmr.msra.gmra.mrb[10].mxu1 %vm41_vm0, %v1461_v17  ;;  %2776 = vmatprep.subr.bf16.mxu0 %v2775_v31  ;;  %v1065_v17 = vld [vmem:[%s3697_s1 + $0x128] sm:$0xff] }
0x110b   :  { %2526 = vmatprep.mubr.msk.f32.mxu1 %vm41_vm0, %v1462_v12  ;;  %2766 = vmatpush3.bf16.msra.mxu1 %v2763_v43  ;;  %v2779_v12 = vpack.c.bf16 %v1065_v17, %v1064_v8  ;;  %v1074_v43 = vld [vmem:[%s3697_s1 + $0x170] sm:$0xff] }
0x110c   :  { %2768 = vmatprep.subr.bf16.mxu1 %v2767_v50  ;;  %2778 = vmatpush3.bf16.msra.mxu0 %v2775_v31  ;;  %v2799_v15 = vpack.c.bf16 %v1075_v48, %v1074_v43  ;;  %v2169_v43 = vld [vmem:[%s3697_s1 + $0x1a0] ss:$0 sm:$0xff] }
0x110e   :  { %2527 = vmatmul.mubr.msk.f32.gmra.mrb[12].mxu1 %vm41_vm0, %v1463_v35  ;;  %v2783_v35 = vpack.c.bf16 %v1067_v6, %v1066_v32  ;;  %v1986_v32 = vld [vmem:[%s3698_s2 + $0x90] sm:$0xff] }
0x110f   :  { %2529 = vmatprep.mubr.msk.f32.mxu1 %vm41_vm0, %v1464_v38  ;;  %2770 = vmatpush3.bf16.msra.mxu1 %v2767_v50  ;;  %v1069_v38 = vld [vmem:[%s3697_s1 + $0x148] sm:$0xff]  ;;  %v1076_v50 = vld [vmem:[%s3697_s1 + $0x180] sm:$0xff] }
0x1110   :  { %2780 = vmatprep.subr.bf16.mxu1 %v2779_v12  ;;  %v2787_v39 = vpack.c.bf16 %v1069_v38, %v1068_v36  ;;  %v1989_v36 = vld [vmem:[%s3698_s2 + $0xa8] sm:$0xff] }
0x1112   :  { %2530 = vmatmul.mubr.msk.f32.gmra.mrb[14].mxu1 %vm41_vm0, %v1465_v27  ;;  %v1070_v27 = vld [vmem:[%s3697_s1 + $0x150] sm:$0xff] }
0x1113   :  { %2532 = vmatprep.mubr.msk.f32.mxu1 %vm41_vm0, %v1466_v37  ;;  %v2791_v37 = vpack.c.bf16 %v1071_v41, %v1070_v27 }
0x1116   :  { %2533 = vmatmul.mubr.msk.f32.gmra.mrb[16].mxu1 %vm41_vm0, %v1467_v26  ;;  %v1072_v26 = vld [vmem:[%s3697_s1 + $0x160] sm:$0xff] }
0x1117   :  { %v2795_v3 = vpack.c.bf16 %v1073_v42, %v1072_v26 }
0x11dd   :  { %v2525_v51 = vpop.f32.mrb[10].mxu1 }
0x11de   :  { %v1582_v52 = vpop.f32.mrb[11].mxu1 }
0x11e1   :  { %v2528_v53 = vpop.f32.mrb[12].mxu1 }
0x11e2   :  { %1625 = vrot.lane.b32.xlu1 %v2528_v53, %s3029_s7  ;;  %v1592_v54 = vpop.f32.mrb[13].mxu1 }
0x11e5   :  { %v2531_v56 = vpop.f32.mrb[14].mxu1 }
0x11e6   :  { %1623 = vrot.lane.b32.xlu1 %v1592_v54, %s3029_s7  ;;  %v1602_v33 = vpop.f32.mrb[15].mxu1 }
0x11e7   :  { %1631 = vrot.lane.b32.xlu0 %v1602_v33, %s3030_s8 }
0x11e9   :  { %v2534_v34 = vpop.f32.mrb[16].mxu1 }
0x11ea   :  { %1633 = vrot.lane.b32.xlu1 %v2531_v56, %s3030_s8  ;;  %v1612_v57 = vpop.f32.mrb[17].mxu1 }
0x11eb   :  { %1639 = vrot.lane.b32.xlu0 %v1612_v57, %s3031_s9 }
0x11ee   :  { %1641 = vrot.lane.b32.xlu1 %v2534_v34, %s3031_s9 }
0x1254   :  { %v1626_v58 = vpop.permute.xlu1 %1625 }
0x1255   :  { %v1646_v5 = vsel %vm348_vm4, %v2525_v51, %v1626_v58  ;;  %v1077_v51 = vld [vmem:[%s3697_s1 + $0x188] sm:$0xff] }
0x1258   :  { %v1624_v60 = vpop.permute.xlu1 %1623 }
0x1259   :  { %v1632_v61 = vpop.permute.xlu0 %1631  ;;  %v1645_v62 = vsel %vm348_vm4, %v1582_v52, %v1624_v60  ;;  %v2803_v52 = vpack.c.bf16 %v1077_v51, %v1076_v50  ;;  %v2163_v60 = vld [vmem:[%s3697_s1 + $0xfa] ss:$0 sm:$0xff]  ;;  %v2170_v51 = vld [vmem:[%s3697_s1 + $0x1a1] ss:$0 sm:$0xff] }
0x125a   :  { %v1647_v1 = vsel %vm753_vm14, %v1645_v62, %v1632_v61  ;;  %v2164_v62 = vld [vmem:[%s3697_s1 + $0xfb] ss:$0 sm:$0xff] }
0x125c   :  { %v1634_v0 = vpop.permute.xlu1 %1633 }
0x125d   :  { %v1640_v18 = vpop.permute.xlu0 %1639  ;;  %v1648_v7 = vsel %vm753_vm14, %v1646_v5, %v1634_v0 }
0x125e   :  { %v1649_v2 = vsel %vm756_vm15, %v1647_v1, %v1640_v18 }
0x125f   :  { %2543 = vmatprep.mubr.msk.f32.mxu1 %vm193_vm3, %v1649_v2 }
0x1260   :  { %v1642_v10 = vpop.permute.xlu1 %1641 }
0x1261   :  { %v1650_v11 = vsel %vm756_vm15, %v1648_v7, %v1642_v10  ;;  %v1078_v10 = vld [vmem:[%s3697_s1 + $0x190] sm:$0xff] }
0x1262   :  { %2544 = vmatmul.mubr.msk.f32.vlgmr.msra.gmra.mrb[18].mxu1 %vm193_vm3, %v1650_v11  ;;  %v1079_v11 = vld [vmem:[%s3697_s1 + $0x198] sm:$0xff] }
0x1263   :  { %2782 = vmatpush3.bf16.msra.mxu1 %v2779_v12  ;;  %v1987_v12 = vld [vmem:[%s3698_s2 + $0x98] sm:$0xff] }
0x1264   :  { %2784 = vmatprep.subr.bf16.mxu1 %v2783_v35  ;;  %v2811_v6 = vpack.c.bf16 %v1987_v12, %v1986_v32 }
0x1266   :  { %2812 = vmatprep.subr.bf16.mxu0 %v2811_v6 }
0x1267   :  { %2786 = vmatpush3.bf16.msra.mxu1 %v2783_v35  ;;  %v1988_v35 = vld [vmem:[%s3698_s2 + $0xa0] sm:$0xff] }
0x1268   :  { %2788 = vmatprep.subr.bf16.mxu1 %v2787_v39  ;;  %v2815_v38 = vpack.c.bf16 %v1989_v36, %v1988_v35 }
0x126b   :  { %2790 = vmatpush3.bf16.msra.mxu1 %v2787_v39 }
0x126c   :  { %2792 = vmatprep.subr.bf16.mxu1 %v2791_v37 }
0x126f   :  { %2794 = vmatpush3.bf16.msra.mxu1 %v2791_v37 }
0x1270   :  { %2796 = vmatprep.subr.bf16.mxu1 %v2795_v3 }
0x1273   :  { %2798 = vmatpush3.bf16.msra.mxu1 %v2795_v3 }
0x1274   :  { %2800 = vmatprep.subr.bf16.mxu1 %v2799_v15 }
0x1277   :  { %2802 = vmatpush3.bf16.msra.mxu1 %v2799_v15 }
0x1278   :  { %2804 = vmatprep.subr.bf16.mxu1 %v2803_v52 }
0x127b   :  { %2806 = vmatpush3.bf16.msra.mxu1 %v2803_v52 }
0x1335   :  { %v2545_v14 = vpop.f32.mrb[18].mxu1 }
0x1336   :  { %v1733_v19 = vadd.f32 %v2545_v14, %v2160_v13  ;;  %v1727_v20 = vpop.f32.mrb[19].mxu1  ;;  %v2165_v14 = vld [vmem:[%s3698_s2 + $0x89] ss:$0 sm:$0xff] }
0x1337   :  { %v1728_v44 = vadd.f32 %v2160_v13, %v1727_v20  ;;  %v2807_v13 = vpack.c.bf16 %v1079_v11, %v1078_v10 }
0x1338   :  { %v3565_v47 = vadd.f32 %v1733_v19, %v3390_v16 }
0x1339   :  { %v3568_v21 = vadd.f32 %v1728_v44, %v3392_v45  ;;  %2808 = vmatprep.subr.bf16.mxu1 %v2807_v13 }
0x133a   :  { %v1741_v22 = vsel %vm193_vm3, %v3565_v47, 0.0  ;;  %2810 = vmatpush3.bf16.msra.mxu1 %v2807_v13 }
0x133b   :  { %1742 = vadd.xlane.f32.xlu1 %v1741_v22  ;;  %v1738_v23 = vsel %vm193_vm3, %v3568_v21, 0.0 }
0x133c   :  { %1739 = vadd.xlane.f32.xlu0 %v1738_v23 }
0x13c8   :  { %v1743_v24 = vpop.xlane.xlu1 %1742 }
0x13c9   :  { %v1745_v46 = vmul.f32 0.03125, %v1743_v24  ;;  %v1740_v55 = vpop.xlane.xlu0 %1739 }
0x13ca   :  { %v1744_v59 = vmul.f32 0.03125, %v1740_v55  ;;  %v2168_v55 = vld [vmem:[%s3697_s1 + $0xfd] ss:$0 sm:$0xff] }
0x13cb   :  { %v3575_v49 = vsub.f32 %v3565_v47, %v1745_v46 }
0x13cc   :  { %v1746_v16 = vsub.f32 %v3568_v21, %v1744_v59 }
0x13cd   :  { %v1749_v28 = vmul.f32 %v3575_v49, %v3575_v49 }
0x13ce   :  { %v1748_v25 = vmul.f32 %v1746_v16, %v1746_v16 }
0x13cf   :  { %v1753_v40 = vsel %vm193_vm3, %v1749_v28, 0.0 }
0x13d0   :  { %v1750_v45 = vsel %vm193_vm3, %v1748_v25, 0.0 }
0x13d1   :  { %1751 = vadd.xlane.f32.xlu0 %v1750_v45 }
0x13d5   :  { %1754 = vadd.xlane.f32.xlu0 %v1753_v40 }
0x145e   :  { %v1752_v53 = vpop.xlane.xlu0 %1751 }
0x145f   :  { %v1756_v54 = vmul.f32 0.03125, %v1752_v53 }
0x1461   :  { %v1758_v56 = vadd.f32 1e-05, %v1756_v54 }
0x1462   :  { %v1755_v33 = vpop.xlane.xlu0 %1754 }
0x1463   :  { %2989 = vrsqrt.f32 %v1758_v56  ;;  %v1757_v34 = vmul.f32 0.03125, %v1755_v33 }
0x1465   :  { %v1759_v57 = vadd.f32 1e-05, %v1757_v34 }
0x1467   :  { %2991 = vrsqrt.f32 %v1759_v57 }
0x146d   :  { %v2990_v58 = vpop.eup %2989 }
0x146e   :  { %v1762_v61 = vmul.f32 %v2990_v58, %v1746_v16 }
0x1470   :  { %v1768_v0 = vmul.f32 %v2163_v60, %v1762_v61 }
0x1471   :  { %v2992_v1 = vpop.eup %2991 }
0x1472   :  { %v1763_v18 = vmul.f32 %v2992_v1, %v3575_v49  ;;  %v1774_v2 = vadd.f32 %v2164_v62, %v1768_v0 }
0x1474   :  { %v1769_v5 = vmul.f32 %v2163_v60, %v1763_v18  ;;  %2554 = vmatprep.mubr.msk.f32.mxu0 %vm193_vm3, %v1774_v2 }
0x1476   :  { %v1775_v7 = vadd.f32 %v2164_v62, %v1769_v5 }
0x1478   :  { %2555 = vmatmul.mubr.msk.f32.vlgmr.msra.gmra.mrb[26].mxu0 %vm193_vm3, %v1775_v7 }
0x1479   :  { %2814 = vmatpush3.bf16.msra.mxu0 %v2811_v6 }
0x147a   :  { %2816 = vmatprep.subr.bf16.mxu0 %v2815_v38 }
0x147d   :  { %2818 = vmatpush3.bf16.msra.mxu0 %v2815_v38 }
0x154b   :  { %v2556_v19 = vpop.f32.mrb[26].mxu0 }
0x154c   :  { %v1858_v20 = vadd.f32 %v2556_v19, %v2165_v14  ;;  %v1852_v44 = vpop.f32.mrb[27].mxu0 }
0x154d   :  { %v1853_v22 = vadd.f32 %v2165_v14, %v1852_v44 }
0x154e   :  { %v1862_v24 = vmax.f32 %v1858_v20, 0.0 }
0x154f   :  { %v1861_v23 = vmax.f32 %v1853_v22, 0.0 }
0x1551   :  { %2589 = vmatprep.mubr.f32.mxu1 %v1861_v23 }
0x1552   :  { %2590 = vmatmul.mubr.f32.vlgmr.msra.gmra.mrb[20].mxu1 %v1862_v24 }
0x1625   :  { %v2591_v46 = vpop.f32.mrb[20].mxu1 }
0x1626   :  { %v1939_v59 = vadd.f32 %v2591_v46, %v3565_v47  ;;  %v1929_v49 = vpop.f32.mrb[21].mxu1 }
0x1627   :  { %v1938_v16 = vadd.f32 %v1929_v49, %v3568_v21 }
0x1628   :  { %v1945_v25 = vadd.f32 %v2168_v55, %v1939_v59 }
0x1629   :  { %v1944_v45 = vadd.f32 %v2168_v55, %v1938_v16 }
0x162a   :  { %v1951_v28 = vsel %vm193_vm3, %v1945_v25, 0.0 }
0x162b   :  { %1952 = vadd.xlane.f32.xlu0 %v1951_v28  ;;  %v1948_v40 = vsel %vm193_vm3, %v1944_v45, 0.0 }
0x162c   :  { %1949 = vadd.xlane.f32.xlu1 %v1948_v40 }
0x16b8   :  { %v1953_v63 = vpop.xlane.xlu0 %1952 }
0x16b9   :  { %v1955_v4 = vmul.f32 0.03125, %v1953_v63  ;;  %v1950_v29 = vpop.xlane.xlu1 %1949 }
0x16ba   :  { %v1954_v30 = vmul.f32 0.03125, %v1950_v29 }
0x16bb   :  { %v1957_v9 = vsub.f32 %v1945_v25, %v1955_v4 }
0x16bc   :  { %v1956_v31 = vsub.f32 %v1944_v45, %v1954_v30 }
0x16bd   :  { %v1959_v8 = vmul.f32 %v1957_v9, %v1957_v9 }
0x16be   :  { %v1958_v17 = vmul.f32 %v1956_v31, %v1956_v31 }
0x16bf   :  { %v1963_v47 = vsel %vm193_vm3, %v1959_v8, 0.0 }
0x16c0   :  { %1964 = vadd.xlane.f32.xlu0 %v1963_v47  ;;  %v1960_v21 = vsel %vm193_vm3, %v1958_v17, 0.0 }
0x16c1   :  { %1961 = vadd.xlane.f32.xlu1 %v1960_v21 }
0x174d   :  { %v1965_v39 = vpop.xlane.xlu0 %1964 }
0x174e   :  { %v1967_v27 = vmul.f32 0.03125, %v1965_v39  ;;  %v1962_v41 = vpop.xlane.xlu1 %1961 }
0x174f   :  { %v1966_v37 = vmul.f32 0.03125, %v1962_v41 }
0x1750   :  { %v1969_v26 = vadd.f32 1e-05, %v1967_v27 }
0x1751   :  { %v1968_v42 = vadd.f32 1e-05, %v1966_v37 }
0x1752   :  { %2993 = vrsqrt.f32 %v1969_v26 }
0x1753   :  { %2995 = vrsqrt.f32 %v1968_v42 }
0x175c   :  { %v2994_v3 = vpop.eup %2993 }
0x175d   :  { %v2996_v48 = vpop.eup %2995  ;;  %v1973_v15 = vmul.f32 %v2994_v3, %v1957_v9 }
0x175e   :  { %v1972_v50 = vmul.f32 %v2996_v48, %v1956_v31 }
0x175f   :  { %v1979_v52 = vmul.f32 %v2169_v43, %v1973_v15 }
0x1760   :  { %v1978_v53 = vmul.f32 %v2169_v43, %v1972_v50 }
0x1761   :  { %v1985_v56 = vadd.f32 %v2170_v51, %v1979_v52 }
0x1762   :  { %v1984_v54 = vadd.f32 %v2170_v51, %v1978_v53 }
0x1764   :  { %2600 = vmatprep.mubr.msk.f32.mxu0 %vm193_vm3, %v1984_v54 }
0x1765   :  { %2601 = vmatmul.mubr.msk.f32.vlgmr.msra.gmra.mrb[28].mxu0 %vm193_vm3, %v1985_v56 }
0x1838   :  { %v2602_v33 = vpop.f32.mrb[28].mxu0 }
0x1839   :  { %2072 = vst [vmem:[#allocation2 + $0x8] sm:$0xff] %v2602_v33  ;;  %v2062_v34 = vpop.f32.mrb[29].mxu0 }
0x183a   :  { %2071 = vst [vmem:[#allocation2] sm:$0xff] %v2062_v34 }
0x183b   :  { %3008 = shalt.err (!%p3005_p4)
}
0x183c   :  { %s3009_s30 = scalar_lea.hbm %s3699_s3, 256 }
0x183d   :  { %p3010_p5 = scmp.ne.s32.totalorder %s3699_s3, %s3009_s30  ;;  %p3013_p6 = scmp.lt.u32.totalorder %s3009_s30, %s3699_s3 }
0x183f   :  { %p3015_p7 = pnand %p3013_p6, %p3010_p5 }
0x1841   :  { %3018 = shalt.err (!%p3015_p7)
}
0x1842   :  { %s3033_s11 = smov 128  }
0x1843   :  { %2084 = dma.vmem_to_hbm [thread:$0]  %s2079_s28, 256, %s3699_s3, [#allocation3], %s3033_s11, %s3033_s11, %s3029_s7  }
0x1844   :  { %3019 = dma.done.wait [#allocation3], 256  }
0x1845   :  { %3020 = vsyncadd [#allocation3], 4294967040 }
0x1846   :  { %2088 = vsyncpa [#allocation3], 1 }

</bundles_post_ra>
